<compile_context>
chip_gen: v6e
topology: v6e:2x2x1
jax: 0.10.0
libtpu: 0.0.40
codegen_flags: <defaults>
</compile_context>

<pallas_src>
import functools
import math

import jax
import jax.numpy as jnp
from jax import lax
from jax.experimental import pallas as pl
from jax.experimental.pallas import tpu as pltpu


def _gat_kernel(x_ref, w_ref, asrc_ref, adst_ref, bias_ref, adj_ref, o_ref,
                xw_sc, asrc_sc, adst_sc, recv_sc, *, neg_slope):
    r = pl.program_id(1)
    num_r = pl.num_programs(1)
    row_block, n = adj_ref.shape

    # ---- once per head (first row block): projection + attention projections ----
    @pl.when(r == 0)
    def _init():
        # bf16 inputs, f32 accumulation on the MXU.  Only head h's column
        # block of W is used, so total projection FLOPs over the head axis
        # equal a single x @ W.
        xw = jnp.dot(x_ref[...], w_ref[...],
                     preferred_element_type=jnp.float32)                      # [N, Fo]
        xw_sc[...] = xw
        # <xw_i, att_src_h>, <xw_j, att_dst_h>, hoisted out of the row loop.
        asrc_sc[...] = jnp.dot(xw, asrc_ref[...],
                               preferred_element_type=jnp.float32)            # [N, 1]
        adst_sc[...] = lax.dot_general(adst_ref[...], xw,
                                       (((1,), (1,)), ((), ())),
                                       preferred_element_type=jnp.float32)    # [1, N]
        recv_sc[...] = jnp.zeros_like(recv_sc)

    # ---- per source-row block: masked row softmax + column-sum accumulation ----
    row0 = pl.multiple_of(r * row_block, row_block)
    a_src = asrc_sc[pl.ds(row0, row_block), :]                  # [TR, 1]
    logits = a_src + adst_sc[...]                               # [TR, N]
    logits = jnp.maximum(logits, neg_slope * logits)            # leaky_relu, one VPU op

    adj = adj_ref[...].astype(jnp.float32)                      # int8 {0,1} -> f32
    neg_big = jnp.float32(-1e30)                                # f32 only; never bf16
    lm = jnp.where(adj > 0.0, logits, neg_big)
    row_max = jnp.max(lm, axis=1, keepdims=True)                # [TR, 1]
    # Non-edges sit at ~-1e30 after the shift, so exp underflows to exactly 0:
    # no second mask / select needed.
    e = jnp.exp(lm - row_max)                                   # [TR, N]

    # Row sum and column sum on the (otherwise idle) MXU instead of XLU/VPU.
    ones_col = jnp.ones((n, 1), jnp.float32)
    denom = jnp.dot(e, ones_col, preferred_element_type=jnp.float32)          # [TR, 1]
    # Guard source rows with no outgoing edge (whole row masked).
    row_ok = (row_max > jnp.float32(-1e29)).astype(jnp.float32)               # [TR, 1]
    inv_denom = pl.reciprocal(denom, approx=True) * row_ok                    # [TR, 1]
    # recv[j] += sum_i e[i, j] / denom[i]   ==   e^T @ inv_denom  (MXU).
    recv_sc[...] += lax.dot_general(e, inv_denom, (((0,), (0,)), ((), ())),
                                    preferred_element_type=jnp.float32)       # [N, 1]

    # ---- once per head (last row block): scale features, add bias, emit ----
    @pl.when(r == num_r - 1)
    def _finalize():
        o_ref[...] = xw_sc[...] * recv_sc[...] + bias_ref[...]  # [N, Fo]


def gat_conv(x, weight, att, bias, adj, *, heads, out_features, neg_slope=0.2,
             row_block=None):
    """x: [N, F_in], weight: [F_in, H*Fo], att: [1, H, 2*Fo], bias: [H*Fo], adj: [N, N]."""
    n, f_in = x.shape
    f_out = out_features

    if row_block is None:
        row_block = n if n <= 512 else 512
    assert n % row_block == 0, "row_block must divide the number of nodes"
    assert row_block == n or row_block % 32 == 0, "int8 adj tiles want sublane multiples of 32"

    # Per-head parameter blocks (plain-JAX glue, done once in HBM).
    w_h = weight.reshape(f_in, heads, f_out).transpose(1, 0, 2).astype(jnp.bfloat16)  # [H, Fin, Fo]
    att_src = att[0, :, :f_out].reshape(heads, f_out, 1).astype(jnp.float32)          # [H, Fo, 1]
    att_dst = att[0, :, f_out:].reshape(heads, 1, f_out).astype(jnp.float32)          # [H, 1, Fo]
    bias_h = bias.reshape(heads, 1, f_out).astype(jnp.float32)                        # [H, 1, Fo]

    x_bf16 = x.astype(jnp.bfloat16)
    adj_i8 = (adj != 0).astype(jnp.int8)      # 4x less HBM/DMA than f32

    kernel = functools.partial(_gat_kernel, neg_slope=neg_slope)
    out3 = pl.pallas_call(
        kernel,
        out_shape=jax.ShapeDtypeStruct((heads, n, f_out), jnp.float32),
        grid_spec=pltpu.PrefetchScalarGridSpec(
            num_scalar_prefetch=0,
            grid=(heads, n // row_block),
            in_specs=[
                pl.BlockSpec((n, f_in), lambda h, r: (0, 0)),               # x (bf16, resident)
                pl.BlockSpec((None, f_in, f_out), lambda h, r: (h, 0, 0)),  # W head block (bf16)
                pl.BlockSpec((None, f_out, 1), lambda h, r: (h, 0, 0)),     # att_src head block
                pl.BlockSpec((None, 1, f_out), lambda h, r: (h, 0, 0)),     # att_dst head block
                pl.BlockSpec((None, 1, f_out), lambda h, r: (h, 0, 0)),     # bias head block
                pl.BlockSpec((row_block, n), lambda h, r: (r, 0)),          # adj row tile (streamed)
            ],
            out_specs=pl.BlockSpec((None, n, f_out), lambda h, r: (h, 0, 0)),
            scratch_shapes=[
                pltpu.VMEM((n, f_out), jnp.float32),   # xw (head block of x @ W)
                pltpu.VMEM((n, 1), jnp.float32),       # <xw, att_src> per source node
                pltpu.VMEM((1, n), jnp.float32),       # <xw, att_dst> per destination node
                pltpu.VMEM((n, 1), jnp.float32),       # recv accumulator
            ],
        ),
        compiler_params=pltpu.CompilerParams(
            dimension_semantics=("parallel", "arbitrary"),  # heads -> v7x megacore
            vmem_limit_bytes=48 * 1024 * 1024,              # > 16/32 MiB scoped defaults, < 64 MiB v7x
        ),
    )(x_bf16, w_h, att_src, att_dst, bias_h, adj_i8)

    # [H, N, Fo] -> [N, H*Fo]   (concat=True).  When F_out % 128 == 0 the kernel
    # could emit [N, H*Fo] directly and skip this small transpose.
    return jnp.transpose(out3, (1, 0, 2)).reshape(n, heads * f_out)


def gat_reference(x, weight, att, bias, indices, n, heads, out_features, neg_slope):
    """Pure-JAX (f32) mirror of the PyTorch forward, edge-list formulation."""
    xw = x @ weight
    xh = xw.reshape(n, heads, out_features)
    src, dst = indices[0], indices[1]
    cat = jnp.concatenate([xh[src], xh[dst]], axis=-1)            # [E, H, 2Fo]
    alpha = (cat * att).sum(-1)                                   # [E, H]
    alpha = jnp.where(alpha >= 0.0, alpha, neg_slope * alpha)     # leaky_relu
    recvs = []
    for h in range(heads):
        a_h = alpha[:, h]
        m = jax.ops.segment_max(a_h, src, num_segments=n)
        e = jnp.exp(a_h - m[src])
        d = jax.ops.segment_sum(e, src, num_segments=n)
        sm = e / d[src]
        recvs.append(jax.ops.segment_sum(sm, dst, num_segments=n))
    recv = jnp.stack(recvs, axis=1)                               # [N, H]
    out = (xh * recv[:, :, None]).reshape(n, heads * out_features)
    return out + bias


if __name__ == "__main__":
    N, F_IN, HEADS, F_OUT = 256, 16, 2, 8
    NEG_SLOPE = 0.2
    ROW_BLOCK = 64          # 4 adjacency row tiles -> exercises the accumulator

    key = jax.random.PRNGKey(0)
    k1, k2, k3, k4 = jax.random.split(key, 4)

    # Deterministic glorot-style init (matches reset_parameters' glorot(weight/att)).
    w_bound = math.sqrt(6.0 / (F_IN + HEADS * F_OUT))
    weight = jax.random.uniform(k1, (F_IN, HEADS * F_OUT), jnp.float32, -w_bound, w_bound)
    a_bound = math.sqrt(6.0 / (HEADS + 2 * F_OUT))
    att = jax.random.uniform(k2, (1, HEADS, 2 * F_OUT), jnp.float32, -a_bound, a_bound)
    bias = jax.random.uniform(k3, (HEADS * F_OUT,), jnp.float32, -0.1, 0.1)
    x = jax.random.normal(k4, (N, F_IN), jnp.float32)

    # Deterministic edge list: self loops + ring in both directions (out-degree 3).
    base = jnp.arange(N, dtype=jnp.int32)
    src = jnp.concatenate([base, base, base])
    dst = jnp.concatenate([base, (base + 1) % N, (base - 1) % N])
    indices = jnp.stack([src, dst])                               # [2, E]
    adj = jnp.zeros((N, N), jnp.float32).at[indices[0], indices[1]].set(1.0)

    out = gat_conv(x, weight, att, bias, adj, heads=HEADS, out_features=F_OUT,
                   neg_slope=NEG_SLOPE, row_block=ROW_BLOCK)
    out = jax.block_until_ready(out)

    ref = gat_reference(x, weight, att, bias, indices, N, HEADS, F_OUT, NEG_SLOPE)
    assert out.shape == (N, HEADS * F_OUT)
    # bf16 feature projection + approx reciprocal in the kernel vs. an f32
    # reference => tolerance loosened accordingly (observed error ~1e-2 worst).
    max_err = float(jnp.max(jnp.abs(out - ref)))
    assert jnp.allclose(out, ref, atol=3e-2, rtol=3e-2), max_err

    print("KERNEL_OK")
</pallas_src>

<mosaic_0001>
module attributes {stable_mosaic.version = 11 : i64} {
  func.func @_gat_kernel(%arg0: i32, %arg1: i32, %arg2: memref<256x16xbf16, #tpu.memory_space<vmem>>, %arg3: memref<1x16x8xbf16, #tpu.memory_space<vmem>>, %arg4: memref<1x8x1xf32, #tpu.memory_space<vmem>>, %arg5: memref<1x1x8xf32, #tpu.memory_space<vmem>>, %arg6: memref<1x1x8xf32, #tpu.memory_space<vmem>>, %arg7: memref<64x256xi8, #tpu.memory_space<vmem>>, %arg8: memref<1x256x8xf32, #tpu.memory_space<vmem>>, %arg9: memref<256x8xf32, #tpu.memory_space<vmem>>, %arg10: memref<256x1xf32, #tpu.memory_space<vmem>>, %arg11: memref<1x256xf32, #tpu.memory_space<vmem>>, %arg12: memref<256x1xf32, #tpu.memory_space<vmem>>) attributes {dimension_semantics = [#tpu.dimension_semantics<parallel>, #tpu.dimension_semantics<arbitrary>], iteration_bounds = array<i64: 2, 4>, scalar_prefetch = 0 : i64, scratch_operands = 4 : i64, tpu.core_type = #tpu.core_type<tc>, window_params = [{pipeline_mode = #tpu.pipeline_mode<synchronous>, transform_indices = @transform_0, window_bounds = array<i64: 256, 16>}, {transform_indices = @transform_1, window_bounds = array<i64: 1, 16, 8>}, {transform_indices = @transform_2, window_bounds = array<i64: 1, 8, 1>}, {transform_indices = @transform_3, window_bounds = array<i64: 1, 1, 8>}, {transform_indices = @transform_4, window_bounds = array<i64: 1, 1, 8>}, {transform_indices = @transform_5, window_bounds = array<i64: 64, 256>}, {transform_indices = @transform_6, window_bounds = array<i64: 1, 256, 8>}]} {
    %c0_i32 = arith.constant 0 : i32
    %0 = arith.cmpi eq, %arg1, %c0_i32 : i32
    %1 = arith.extui %0 : i1 to i32
    %c0_i32_0 = arith.constant 0 : i32
    %2 = arith.cmpi ne, %1, %c0_i32_0 : i32
    scf.if %2 {
      %c0_17 = arith.constant 0 : index
      %c0_18 = arith.constant 0 : index
      %40 = vector.load %arg2[%c0_17, %c0_18] : memref<256x16xbf16, #tpu.memory_space<vmem>>, vector<256x16xbf16>
      %c0_19 = arith.constant 0 : index
      %c0_20 = arith.constant 0 : index
      %c0_21 = arith.constant 0 : index
      %41 = vector.load %arg3[%c0_19, %c0_20, %c0_21] : memref<1x16x8xbf16, #tpu.memory_space<vmem>>, vector<1x16x8xbf16>
      %42 = vector.shape_cast %41 : vector<1x16x8xbf16> to vector<16x8xbf16>
      %cst_22 = arith.constant dense<0.000000e+00> : vector<256x8xf32>
      %43 = tpu.matmul %40, %42, %cst_22 {dimension_numbers = #tpu.dot_dimension_numbers<[1], [0], [0], [1], [0, 0, 1, 1], [], []>} : vector<256x16xbf16>, vector<16x8xbf16>, vector<256x8xf32> -> vector<256x8xf32>
      %c0_23 = arith.constant 0 : index
      %c0_24 = arith.constant 0 : index
      %44 = vector.load %arg9[%c0_23, %c0_24] : memref<256x8xf32, #tpu.memory_space<vmem>>, vector<256x8xf32>
      tpu.vector_store %arg9[%c0_23, %c0_24], %43 {strides = array<i32>} : memref<256x8xf32, #tpu.memory_space<vmem>>, vector<256x8xf32>,
      %c0_25 = arith.constant 0 : index
      %c0_26 = arith.constant 0 : index
      %c0_27 = arith.constant 0 : index
      %45 = vector.load %arg4[%c0_25, %c0_26, %c0_27] : memref<1x8x1xf32, #tpu.memory_space<vmem>>, vector<1x8x1xf32>
      %46 = vector.shape_cast %45 : vector<1x8x1xf32> to vector<8x1xf32>
      %cst_28 = arith.constant dense<0.000000e+00> : vector<256x1xf32>
      %47 = tpu.matmul %43, %46, %cst_28 {dimension_numbers = #tpu.dot_dimension_numbers<[1], [0], [0], [1], [0, 0, 1, 1], [], []>} : vector<256x8xf32>, vector<8x1xf32>, vector<256x1xf32> -> vector<256x1xf32>
      %c0_29 = arith.constant 0 : index
      %c0_30 = arith.constant 0 : index
      %48 = vector.load %arg10[%c0_29, %c0_30] : memref<256x1xf32, #tpu.memory_space<vmem>>, vector<256x1xf32>
      tpu.vector_store %arg10[%c0_29, %c0_30], %47 {strides = array<i32>} : memref<256x1xf32, #tpu.memory_space<vmem>>, vector<256x1xf32>,
      %c0_31 = arith.constant 0 : index
      %c0_32 = arith.constant 0 : index
      %c0_33 = arith.constant 0 : index
      %49 = vector.load %arg5[%c0_31, %c0_32, %c0_33] : memref<1x1x8xf32, #tpu.memory_space<vmem>>, vector<1x1x8xf32>
      %50 = vector.shape_cast %49 : vector<1x1x8xf32> to vector<1x8xf32>
      %cst_34 = arith.constant dense<0.000000e+00> : vector<1x256xf32>
      %51 = tpu.matmul %50, %43, %cst_34 {dimension_numbers = #tpu.dot_dimension_numbers<[1], [1], [0], [0], [0, 0, 1, 0], [], []>} : vector<1x8xf32>, vector<256x8xf32>, vector<1x256xf32> -> vector<1x256xf32>
      %c0_35 = arith.constant 0 : index
      %c0_36 = arith.constant 0 : index
      %52 = vector.load %arg11[%c0_35, %c0_36] : memref<1x256xf32, #tpu.memory_space<vmem>>, vector<1x256xf32>
      tpu.vector_store %arg11[%c0_35, %c0_36], %51 {strides = array<i32>} : memref<1x256xf32, #tpu.memory_space<vmem>>, vector<1x256xf32>,
      %cst_37 = arith.constant 0.000000e+00 : f32
      %53 = vector.broadcast %cst_37 : f32 to vector<256x1xf32>
      %c0_38 = arith.constant 0 : index
      %c0_39 = arith.constant 0 : index
      %54 = vector.load %arg12[%c0_38, %c0_39] : memref<256x1xf32, #tpu.memory_space<vmem>>, vector<256x1xf32>
      tpu.vector_store %arg12[%c0_38, %c0_39], %53 {strides = array<i32>} : memref<256x1xf32, #tpu.memory_space<vmem>>, vector<256x1xf32>,
    } else {
    }
    %c64_i32 = arith.constant 64 : i32
    %3 = arith.muli %arg1, %c64_i32 : i32
    %4 = tpu.assume_multiple %3, 64 : i32
    %5 = arith.index_cast %4 : i32 to index
    %c0 = arith.constant 0 : index
    %6 = vector.load %arg10[%5, %c0] : memref<256x1xf32, #tpu.memory_space<vmem>>, vector<64x1xf32>
    %c0_1 = arith.constant 0 : index
    %c0_2 = arith.constant 0 : index
    %7 = vector.load %arg11[%c0_1, %c0_2] : memref<1x256xf32, #tpu.memory_space<vmem>>, vector<1x256xf32>
    %8 = vector.broadcast %6 : vector<64x1xf32> to vector<64x256xf32>
    %9 = vector.broadcast %7 : vector<1x256xf32> to vector<64x256xf32>
    %10 = arith.addf %8, %9 : vector<64x256xf32>
    %cst = arith.constant 2.000000e-01 : f32
    %11 = vector.broadcast %cst : f32 to vector<64x256xf32>
    %12 = arith.mulf %11, %10 : vector<64x256xf32>
    %13 = arith.maximumf %10, %12 : vector<64x256xf32>
    %c0_3 = arith.constant 0 : index
    %c0_4 = arith.constant 0 : index
    %14 = vector.load %arg7[%c0_3, %c0_4] : memref<64x256xi8, #tpu.memory_space<vmem>>, vector<64x256xi8>
    %15 = arith.sitofp %14 : vector<64x256xi8> to vector<64x256xf32>
    %cst_5 = arith.constant 0.000000e+00 : f32
    %16 = vector.broadcast %cst_5 : f32 to vector<64x256xf32>
    %17 = arith.cmpf ogt, %15, %16 : vector<64x256xf32>
    %cst_6 = arith.constant -1.000000e+30 : f32
    %18 = vector.broadcast %cst_6 : f32 to vector<64x256xf32>
    %19 = arith.select %17, %13, %18 : vector<64x256xi1>, vector<64x256xf32>
    %cst_7 = arith.constant dense<0xFF800000> : vector<64xf32>
    %20 = vector.multi_reduction <maximumf>, %19, %cst_7 [1] : vector<64x256xf32> to vector<64xf32>
    %21 = vector.shape_cast %20 : vector<64xf32> to vector<64x1xf32>
    %22 = vector.broadcast %21 : vector<64x1xf32> to vector<64x256xf32>
    %23 = arith.subf %19, %22 : vector<64x256xf32>
    %24 = math.exp %23 : vector<64x256xf32>
    %cst_8 = arith.constant 1.000000e+00 : f32
    %25 = vector.broadcast %cst_8 : f32 to vector<256x1xf32>
    %cst_9 = arith.constant dense<0.000000e+00> : vector<64x1xf32>
    %26 = tpu.matmul %24, %25, %cst_9 {dimension_numbers = #tpu.dot_dimension_numbers<[1], [0], [0], [1], [0, 0, 1, 1], [], []>} : vector<64x256xf32>, vector<256x1xf32>, vector<64x1xf32> -> vector<64x1xf32>
    %cst_10 = arith.constant -1.000000e+29 : f32
    %27 = vector.broadcast %cst_10 : f32 to vector<64x1xf32>
    %28 = arith.cmpf ogt, %21, %27 : vector<64x1xf32>
    %29 = arith.extui %28 : vector<64x1xi1> to vector<64x1xi32>
    %30 = arith.sitofp %29 : vector<64x1xi32> to vector<64x1xf32>
    %31 = tpu.reciprocal %26 {approx = true} : vector<64x1xf32> -> vector<64x1xf32>
    %32 = arith.mulf %31, %30 : vector<64x1xf32>
    %c0_11 = arith.constant 0 : index
    %c0_12 = arith.constant 0 : index
    %33 = vector.load %arg12[%c0_11, %c0_12] : memref<256x1xf32, #tpu.memory_space<vmem>>, vector<256x1xf32>
    %cst_13 = arith.constant dense<0.000000e+00> : vector<256x1xf32>
    %34 = tpu.matmul %24, %32, %cst_13 {dimension_numbers = #tpu.dot_dimension_numbers<[0], [0], [1], [1], [0, 1, 1, 1], [], []>} : vector<64x256xf32>, vector<64x1xf32>, vector<256x1xf32> -> vector<256x1xf32>
    %35 = arith.addf %33, %34 : vector<256x1xf32>
    %c0_14 = arith.constant 0 : index
    %c0_15 = arith.constant 0 : index
    %36 = vector.load %arg12[%c0_14, %c0_15] : memref<256x1xf32, #tpu.memory_space<vmem>>, vector<256x1xf32>
    tpu.vector_store %arg12[%c0_14, %c0_15], %35 {strides = array<i32>} : memref<256x1xf32, #tpu.memory_space<vmem>>, vector<256x1xf32>,
    %c3_i32 = arith.constant 3 : i32
    %37 = arith.cmpi eq, %arg1, %c3_i32 : i32
    %38 = arith.extui %37 : i1 to i32
    %c0_i32_16 = arith.constant 0 : i32
    %39 = arith.cmpi ne, %38, %c0_i32_16 : i32
    scf.if %39 {
      %c0_17 = arith.constant 0 : index
      %c0_18 = arith.constant 0 : index
      %40 = vector.load %arg9[%c0_17, %c0_18] : memref<256x8xf32, #tpu.memory_space<vmem>>, vector<256x8xf32>
      %c0_19 = arith.constant 0 : index
      %c0_20 = arith.constant 0 : index
      %41 = vector.load %arg12[%c0_19, %c0_20] : memref<256x1xf32, #tpu.memory_space<vmem>>, vector<256x1xf32>
      %42 = vector.broadcast %41 : vector<256x1xf32> to vector<256x8xf32>
      %43 = arith.mulf %40, %42 : vector<256x8xf32>
      %c0_21 = arith.constant 0 : index
      %c0_22 = arith.constant 0 : index
      %c0_23 = arith.constant 0 : index
      %44 = vector.load %arg6[%c0_21, %c0_22, %c0_23] : memref<1x1x8xf32, #tpu.memory_space<vmem>>, vector<1x1x8xf32>
      %45 = vector.shape_cast %44 : vector<1x1x8xf32> to vector<1x8xf32>
      %46 = vector.broadcast %45 : vector<1x8xf32> to vector<256x8xf32>
      %47 = arith.addf %43, %46 : vector<256x8xf32>
      %c0_24 = arith.constant 0 : index
      %c0_25 = arith.constant 0 : index
      %c0_26 = arith.constant 0 : index
      %48 = vector.load %arg8[%c0_24, %c0_25, %c0_26] : memref<1x256x8xf32, #tpu.memory_space<vmem>>, vector<1x256x8xf32>
      %49 = vector.shape_cast %48 : vector<1x256x8xf32> to vector<256x8xf32>
      %50 = vector.shape_cast %47 : vector<256x8xf32> to vector<1x256x8xf32>
      tpu.vector_store %arg8[%c0_24, %c0_25, %c0_26], %50 {strides = array<i32>} : memref<1x256x8xf32, #tpu.memory_space<vmem>>, vector<1x256x8xf32>,
    } else {
    }
    return
  }
  func.func @transform_0(%arg0: i32, %arg1: i32) -> (i32, i32) {
    %c0_i32 = arith.constant 0 : i32
    %c0_i32_0 = arith.constant 0 : i32
    %c0_i32_1 = arith.constant 0 : i32
    return %c0_i32, %c0_i32_0 : i32, i32
  }
  func.func @transform_1(%arg0: i32, %arg1: i32) -> (i32, i32, i32) {
    %c0_i32 = arith.constant 0 : i32
    %c0_i32_0 = arith.constant 0 : i32
    %c0_i32_1 = arith.constant 0 : i32
    return %arg0, %c0_i32, %c0_i32_0 : i32, i32, i32
  }
  func.func @transform_2(%arg0: i32, %arg1: i32) -> (i32, i32, i32) {
    %c0_i32 = arith.constant 0 : i32
    %c0_i32_0 = arith.constant 0 : i32
    %c0_i32_1 = arith.constant 0 : i32
    return %arg0, %c0_i32, %c0_i32_0 : i32, i32, i32
  }
  func.func @transform_3(%arg0: i32, %arg1: i32) -> (i32, i32, i32) {
    %c0_i32 = arith.constant 0 : i32
    %c0_i32_0 = arith.constant 0 : i32
    %c0_i32_1 = arith.constant 0 : i32
    return %arg0, %c0_i32, %c0_i32_0 : i32, i32, i32
  }
  func.func @transform_4(%arg0: i32, %arg1: i32) -> (i32, i32, i32) {
    %c0_i32 = arith.constant 0 : i32
    %c0_i32_0 = arith.constant 0 : i32
    %c0_i32_1 = arith.constant 0 : i32
    return %arg0, %c0_i32, %c0_i32_0 : i32, i32, i32
  }
  func.func @transform_5(%arg0: i32, %arg1: i32) -> (i32, i32) {
    %c0_i32 = arith.constant 0 : i32
    %c0_i32_0 = arith.constant 0 : i32
    return %arg1, %c0_i32 : i32, i32
  }
  func.func @transform_6(%arg0: i32, %arg1: i32) -> (i32, i32, i32) {
    %c0_i32 = arith.constant 0 : i32
    %c0_i32_0 = arith.constant 0 : i32
    %c0_i32_1 = arith.constant 0 : i32
    return %arg0, %c0_i32, %c0_i32_0 : i32, i32, i32
  }
}

</mosaic_0001>

<bundles_post_ra>
// kernel: tpu_custom_call.1
= control target key start
LH: loop header
LB: loop body
LE: loop exit
PB: predicated region body
PF: predicated region fallthrough
CT: control target
= control target key end

     0   :  { %s3207_s21 = smov 0   ;;  %s3209_s22 = smov 0   ;;  %s3997_s0 = inlined_call_operand.vmem [shape: bf16[256,16], index: 0, kind: input, shape index: {}]   ;;  %s3998_s1 = inlined_call_operand.vmem [shape: bf16[2,16,8], index: 1, kind: input, shape index: {}]   ;;  %s3999_s2 = inlined_call_operand.vmem [shape: f32[2,8,1], index: 2, kind: input, shape index: {}]   ;;  %s4000_s3 = inlined_call_operand.vmem [shape: f32[2,1,8], index: 3, kind: input, shape index: {}]   ;;  %s4001_s4 = inlined_call_operand.vmem [shape: f32[2,1,8], index: 4, kind: input, shape index: {}]   ;;  %s4002_s5 = inlined_call_operand.vmem [shape: s8[256,256], index: 5, kind: input, shape index: {}]   ;;  %s4003_s6 = inlined_call_operand.vmem [shape: f32[2,256,8], index: 6, kind: output, shape index: {}]  }
   0x1   :  { %s3211_s23 = smov 0   ;;  %s3213_s24 = smov 0  }
   0x2   :  { %s3215_s25 = smov 0  }
   0x3 LB: > { %s25_s26 = sadd.s32 1, %s3156_s23  ;;  %s28_s27 = sadd.s32 1, %s3160_s24  ;;  %s3164_s25 = sphi %s3215_s25, %s16_s25   ;;  %s3160_s24 = sphi %s3213_s24, %s4010_s24   ;;  %s3156_s23 = sphi %s3211_s23, %s4009_s23   ;;  %s3152_s22 = sphi %s3209_s22, %s4008_s22   ;;  %s3148_s21 = sphi %s3207_s21, %s4007_s21  }
   0x4   : > { %p26_p0 = scmp.ge.s32.totalorder %s25_s26, 4  ;;  %p2511_p1 = scmp.ge.s32.totalorder %s3164_s25, 1 }
   0x5   : > { %p261_p2 = scmp.lt.s32.totalorder %s3164_s25, 9 }
   0x6   : > { %s4012_s26 = smov (%p26_p0, %s25_s26), 0  ;;  %s4014_s27 = smov (!%p26_p0, %s28_s27), %s3160_s24 }
   0x7   : > { %p262_p3 = pnand %p2511_p1, %p261_p2  ;;  %p30_p4 = scmp.ge.s32.totalorder %s4014_s27, 2 }
   0x8   : > { %p307_p5 = scmp.lt.s32.totalorder (!%p262_p3), %s3152_s22, 1  ;;  %s2515_s28 = sshll.u32 (!%p262_p3), %s3148_s21, 1 }
   0x9   : > { %s4016_s27 = smov (%p30_p4, %s4014_s27), 0  ;;  %265 = sbr.rel (%p262_p3) target bundleno = 1544 (0x608), region = 44 }
   0xa   : > { %4004 = sst [smem:[#allocation6_spill]] %s4016_s27  ;;  %p323_p6 = scmp.lt.s32.totalorder (!%p262_p3), %s2515_s28, 7 }
   0xb   : > { %p2520_p7 = scmp.ne.s32.totalorder (!%p262_p3), %s3148_s21, 0 }
   0xe   : > { %s4018_s22 = smov (!%p307_p5, %s3152_s22), 1  ;;  %s4020_s28 = smov (!%p323_p6, %s2515_s28), 7 }
   0xf   : > { %s2664_s29 = sshll.u32 %s4018_s22, 3  ;;  %s321_s17 = scalar_lea.vmem %s4001_s4, %s4018_s22 }
  0x10   : > { %s311_s11 = scalar_lea.vmem %s3998_s1, %s2664_s29  ;;  %s3253_s14 = scalar_lea.vmem %s3999_s2, %s2664_s29 }
  0x11   : > { %s2665_s18 = sshll.u32 %s4020_s28, 4  ;;  %s2666_s30 = sshll.u32 %s4018_s22, 8 }
  0x12   : > { %s3262_s27 = scalar_lea.vmem %s4002_s5, %s2665_s18  ;;  %s3268_s9 = scalar_lea.vmem %s4003_s6, %s2666_s30 }
  0x13   : > { %338 = sbr.rel (%p2520_p7) target bundleno = 548 (0x224), region = 48  ;;  %s4005_s13 = scalar_lea.vmem (!%p2520_p7), %s4000_s3, %s4018_s22 }
  0x18   : > { %v3057_v0 = vld [vmem:[%s311_s11] sm:$0xff]   ;;  %vm459_vm0 = vcmask 130048   ;;  %v3059_v2 = vld [vmem:[%s3997_s0 + $0x8] sm:$0xff]   ;;  %v3060_v3 = vld [vmem:[%s3997_s0 + $0x10] sm:$0xff]   ;;  %vm669_vm1 = vcmask 64512   ;;  %vm1024_vm2 = vcmask 7168  }
  0x19   : > { %v3058_v1 = vld [vmem:[%s3997_s0] sm:$0xff]   ;;  %2847 = vmatprep.subr.bf16.mxu0 %v3057_v0  ;;  %v3061_v4 = vld [vmem:[%s3997_s0 + $0x18] sm:$0xff]   ;;  %v3063_v6 = vld [vmem:[%s3997_s0 + $0x28] sm:$0xff]   ;;  %v3166_v51 = vmov 0.0  }
  0x1a   : > { %2848 = vmatpush3.bf16.msra.mxu0 %v3057_v0  ;;  %2849 = vmatprep.mubr.msk.bf16.mxu0 %vm459_vm0, %v3058_v1  ;;  %v3062_v5 = vld [vmem:[%s3997_s0 + $0x20] sm:$0xff]   ;;  %v3064_v7 = vld [vmem:[%s3997_s0 + $0x30] sm:$0xff]   ;;  %v3065_v8 = vld [vmem:[%s3997_s0 + $0x38] sm:$0xff]   ;;  %1155 = vst.msk [vmem:[#allocation5] sm:$0xff] %vm1024_vm2, %v3166_v51 }
  0x1b   : > { %v3066_v9 = vld [vmem:[%s3997_s0 + $0x40] sm:$0xff]   ;;  %v3067_v10 = vld [vmem:[%s3997_s0 + $0x48] sm:$0xff]   ;;  %v3068_v11 = vld [vmem:[%s3997_s0 + $0x50] sm:$0xff]   ;;  %1156 = vst.msk [vmem:[#allocation5 + $0x8] sm:$0xff] %vm1024_vm2, %v3166_v51 }
  0x1c   : > { %v3069_v12 = vld [vmem:[%s3997_s0 + $0x58] sm:$0xff]   ;;  %v3070_v13 = vld [vmem:[%s3997_s0 + $0x60] sm:$0xff]   ;;  %v3071_v14 = vld [vmem:[%s3997_s0 + $0x68] sm:$0xff]   ;;  %1157 = vst.msk [vmem:[#allocation5 + $0x10] sm:$0xff] %vm1024_vm2, %v3166_v51 }
  0x1d   : > { %2850 = vmatmul.mubr.msk.bf16.vlgmr.msra.gmra.mxu0 %vm459_vm0, %v3059_v2  ;;  %v3072_v15 = vld [vmem:[%s3997_s0 + $0x70] sm:$0xff]   ;;  %v3073_v16 = vld [vmem:[%s3997_s0 + $0x78] sm:$0xff]   ;;  %v702_v17 = vld [vmem:[%s3253_s14] sm:$0xff]  ;;  %1158 = vst.msk [vmem:[#allocation5 + $0x18] sm:$0xff] %vm1024_vm2, %v3166_v51 }
  0x1e   : > { %2853 = vmatprep.mubr.msk.bf16.mxu0 %vm459_vm0, %v3060_v3  ;;  %2881 = vmatprep.subr.mxu1 %v702_v17  ;;  %v1057_v50 = vld [vmem:[%s4005_s13] sm:$0x1]  ;;  %1159 = vst.msk [vmem:[#allocation5 + $0x20] sm:$0xff] %vm1024_vm2, %v3166_v51  ;;  %1160 = vst.msk [vmem:[#allocation5 + $0x28] sm:$0xff] %vm1024_vm2, %v3166_v51 }
  0x1f   : > { %2882 = vmatpush3.msra.mxu1 %v702_v17  ;;  %1161 = vst.msk [vmem:[#allocation5 + $0x30] sm:$0xff] %vm1024_vm2, %v3166_v51  ;;  %1162 = vst.msk [vmem:[#allocation5 + $0x38] sm:$0xff] %vm1024_vm2, %v3166_v51 }
  0x20   : > { %1163 = vst.msk [vmem:[#allocation5 + $0x40] sm:$0xff] %vm1024_vm2, %v3166_v51  ;;  %1164 = vst.msk [vmem:[#allocation5 + $0x48] sm:$0xff] %vm1024_vm2, %v3166_v51 }
  0x21   : > { %1165 = vst.msk [vmem:[#allocation5 + $0x50] sm:$0xff] %vm1024_vm2, %v3166_v51  ;;  %1166 = vst.msk [vmem:[#allocation5 + $0x58] sm:$0xff] %vm1024_vm2, %v3166_v51 }
  0x22   : > { %1167 = vst.msk [vmem:[#allocation5 + $0x60] sm:$0xff] %vm1024_vm2, %v3166_v51  ;;  %1168 = vst.msk [vmem:[#allocation5 + $0x68] sm:$0xff] %vm1024_vm2, %v3166_v51 }
  0x23   : > { %1169 = vst.msk [vmem:[#allocation5 + $0x70] sm:$0xff] %vm1024_vm2, %v3166_v51  ;;  %1170 = vst.msk [vmem:[#allocation5 + $0x78] sm:$0xff] %vm1024_vm2, %v3166_v51 }
  0x24   : > { %1171 = vst.msk [vmem:[#allocation5 + $0x80] sm:$0xff] %vm1024_vm2, %v3166_v51  ;;  %1172 = vst.msk [vmem:[#allocation5 + $0x88] sm:$0xff] %vm1024_vm2, %v3166_v51 }
  0x25   : > { %2854 = vmatmul.mubr.msk.bf16.gmra.mxu0 %vm459_vm0, %v3061_v4  ;;  %1173 = vst.msk [vmem:[#allocation5 + $0x90] sm:$0xff] %vm1024_vm2, %v3166_v51  ;;  %1174 = vst.msk [vmem:[#allocation5 + $0x98] sm:$0xff] %vm1024_vm2, %v3166_v51 }
  0x26   : > { %2857 = vmatprep.mubr.msk.bf16.mxu0 %vm459_vm0, %v3062_v5  ;;  %1175 = vst.msk [vmem:[#allocation5 + $0xa0] sm:$0xff] %vm1024_vm2, %v3166_v51  ;;  %1176 = vst.msk [vmem:[#allocation5 + $0xa8] sm:$0xff] %vm1024_vm2, %v3166_v51 }
  0x27   : > { %1177 = vst.msk [vmem:[#allocation5 + $0xb0] sm:$0xff] %vm1024_vm2, %v3166_v51  ;;  %1178 = vst.msk [vmem:[#allocation5 + $0xb8] sm:$0xff] %vm1024_vm2, %v3166_v51 }
  0x28   : > { %1179 = vst.msk [vmem:[#allocation5 + $0xc0] sm:$0xff] %vm1024_vm2, %v3166_v51  ;;  %1180 = vst.msk [vmem:[#allocation5 + $0xc8] sm:$0xff] %vm1024_vm2, %v3166_v51 }
  0x29   : > { %1181 = vst.msk [vmem:[#allocation5 + $0xd0] sm:$0xff] %vm1024_vm2, %v3166_v51  ;;  %1182 = vst.msk [vmem:[#allocation5 + $0xd8] sm:$0xff] %vm1024_vm2, %v3166_v51 }
  0x2a   : > { %1183 = vst.msk [vmem:[#allocation5 + $0xe0] sm:$0xff] %vm1024_vm2, %v3166_v51  ;;  %1184 = vst.msk [vmem:[#allocation5 + $0xe8] sm:$0xff] %vm1024_vm2, %v3166_v51 }
  0x2b   : > { %1185 = vst.msk [vmem:[#allocation5 + $0xf0] sm:$0xff] %vm1024_vm2, %v3166_v51  ;;  %1186 = vst.msk [vmem:[#allocation5 + $0xf8] sm:$0xff] %vm1024_vm2, %v3166_v51 }
  0x2d   : > { %2858 = vmatmul.mubr.msk.bf16.gmra.mxu0 %vm459_vm0, %v3063_v6 }
  0x2e   : > { %2861 = vmatprep.mubr.msk.bf16.mxu0 %vm459_vm0, %v3064_v7 }
  0x35   : > { %2862 = vmatmul.mubr.msk.bf16.gmra.mxu0 %vm459_vm0, %v3065_v8 }
  0x36   : > { %2865 = vmatprep.mubr.msk.bf16.mxu0 %vm459_vm0, %v3066_v9 }
  0x3d   : > { %2866 = vmatmul.mubr.msk.bf16.gmra.mxu0 %vm459_vm0, %v3067_v10 }
  0x3e   : > { %2869 = vmatprep.mubr.msk.bf16.mxu0 %vm459_vm0, %v3068_v11 }
  0x45   : > { %2870 = vmatmul.mubr.msk.bf16.gmra.mxu0 %vm459_vm0, %v3069_v12 }
  0x46   : > { %2873 = vmatprep.mubr.msk.bf16.mxu0 %vm459_vm0, %v3070_v13 }
  0x4d   : > { %2874 = vmatmul.mubr.msk.bf16.gmra.mxu0 %vm459_vm0, %v3071_v14 }
  0x4e   : > { %2877 = vmatprep.mubr.msk.bf16.mxu0 %vm459_vm0, %v3072_v15 }
  0x55   : > { %2878 = vmatmul.mubr.msk.bf16.gmra.mxu0 %vm459_vm0, %v3073_v16 }
  0xdd   : > { %v3336_v18 = vpop.f32.mrf.mxu0 }
  0xde   : > { %672 = vst.msk [vmem:[#allocation2 + $0x10] sm:$0xff] %vm669_vm1, %v3336_v18 }
  0xdf   : > { %v3340_v19 = vpop.f32.mrf.mxu0 }
  0xe0   : > { %670 = vst.msk [vmem:[#allocation2] sm:$0xff] %vm669_vm1, %v3340_v19  ;;  %2883 = vmatprep.mubr.msk.f32.mxu1 %vm669_vm1, %v3340_v19 }
  0xe1   : > { %v3346_v20 = vpop.f32.mrf.mxu0 }
  0xe2   : > { %673 = vst.msk [vmem:[#allocation2 + $0x18] sm:$0xff] %vm669_vm1, %v3346_v20 }
  0xe3   : > { %v3350_v21 = vpop.f32.mrf.mxu0 }
  0xe4   : > { %671 = vst.msk [vmem:[#allocation2 + $0x8] sm:$0xff] %vm669_vm1, %v3350_v21  ;;  %2884 = vmatmul.mubr.msk.f32.vlgmr.msra.gmra.mxu1 %vm669_vm1, %v3350_v21 }
  0xe5   : > { %v3356_v22 = vpop.f32.mrf.mxu0  ;;  %2886 = vmatprep.mubr.msk.f32.mxu1 %vm669_vm1, %v3336_v18 }
  0xe6   : > { %676 = vst.msk [vmem:[#allocation2 + $0x30] sm:$0xff] %vm669_vm1, %v3356_v22 }
  0xe7   : > { %v3362_v23 = vpop.f32.mrf.mxu0 }
  0xe8   : > { %674 = vst.msk [vmem:[#allocation2 + $0x20] sm:$0xff] %vm669_vm1, %v3362_v23  ;;  %2887 = vmatmul.mubr.msk.f32.gmra.mxu1 %vm669_vm1, %v3346_v20 }
  0xe9   : > { %v3368_v24 = vpop.f32.mrf.mxu0  ;;  %2889 = vmatprep.mubr.msk.f32.mxu1 %vm669_vm1, %v3362_v23 }
  0xea   : > { %677 = vst.msk [vmem:[#allocation2 + $0x38] sm:$0xff] %vm669_vm1, %v3368_v24 }
  0xeb   : > { %v3374_v25 = vpop.f32.mrf.mxu0 }
  0xec   : > { %675 = vst.msk [vmem:[#allocation2 + $0x28] sm:$0xff] %vm669_vm1, %v3374_v25  ;;  %2890 = vmatmul.mubr.msk.f32.gmra.mxu1 %vm669_vm1, %v3374_v25 }
  0xed   : > { %v3380_v26 = vpop.f32.mrf.mxu0  ;;  %2892 = vmatprep.mubr.msk.f32.mxu1 %vm669_vm1, %v3356_v22 }
  0xee   : > { %680 = vst.msk [vmem:[#allocation2 + $0x50] sm:$0xff] %vm669_vm1, %v3380_v26 }
  0xef   : > { %v3386_v27 = vpop.f32.mrf.mxu0 }
  0xf0   : > { %678 = vst.msk [vmem:[#allocation2 + $0x40] sm:$0xff] %vm669_vm1, %v3386_v27  ;;  %2893 = vmatmul.mubr.msk.f32.gmra.mxu1 %vm669_vm1, %v3368_v24 }
  0xf1   : > { %v3392_v28 = vpop.f32.mrf.mxu0  ;;  %2895 = vmatprep.mubr.msk.f32.mxu1 %vm669_vm1, %v3386_v27 }
  0xf2   : > { %681 = vst.msk [vmem:[#allocation2 + $0x58] sm:$0xff] %vm669_vm1, %v3392_v28 }
  0xf3   : > { %v3398_v29 = vpop.f32.mrf.mxu0 }
  0xf4   : > { %679 = vst.msk [vmem:[#allocation2 + $0x48] sm:$0xff] %vm669_vm1, %v3398_v29  ;;  %2896 = vmatmul.mubr.msk.f32.gmra.mxu1 %vm669_vm1, %v3398_v29 }
  0xf5   : > { %v3404_v30 = vpop.f32.mrf.mxu0  ;;  %2898 = vmatprep.mubr.msk.f32.mxu1 %vm669_vm1, %v3380_v26 }
  0xf6   : > { %684 = vst.msk [vmem:[#allocation2 + $0x70] sm:$0xff] %vm669_vm1, %v3404_v30 }
  0xf7   : > { %v3410_v31 = vpop.f32.mrf.mxu0 }
  0xf8   : > { %682 = vst.msk [vmem:[#allocation2 + $0x60] sm:$0xff] %vm669_vm1, %v3410_v31  ;;  %2899 = vmatmul.mubr.msk.f32.gmra.mxu1 %vm669_vm1, %v3392_v28 }
  0xf9   : > { %v2864_v32 = vpop.f32.mrf.mxu0  ;;  %2901 = vmatprep.mubr.msk.f32.mxu1 %vm669_vm1, %v3410_v31 }
  0xfa   : > { %685 = vst.msk [vmem:[#allocation2 + $0x78] sm:$0xff] %vm669_vm1, %v2864_v32 }
  0xfb   : > { %v593_v33 = vpop.f32.mrf.mxu0 }
  0xfc   : > { %683 = vst.msk [vmem:[#allocation2 + $0x68] sm:$0xff] %vm669_vm1, %v593_v33  ;;  %2902 = vmatmul.mubr.msk.f32.gmra.mxu1 %vm669_vm1, %v593_v33 }
  0xfd   : > { %v3421_v34 = vpop.f32.mrf.mxu0  ;;  %2904 = vmatprep.mubr.msk.f32.mxu1 %vm669_vm1, %v3404_v30 }
  0xfe   : > { %688 = vst.msk [vmem:[#allocation2 + $0x90] sm:$0xff] %vm669_vm1, %v3421_v34 }
  0xff   : > { %v3427_v35 = vpop.f32.mrf.mxu0 }
 0x100   : > { %686 = vst.msk [vmem:[#allocation2 + $0x80] sm:$0xff] %vm669_vm1, %v3427_v35  ;;  %2905 = vmatmul.mubr.msk.f32.gmra.mxu1 %vm669_vm1, %v2864_v32 }
 0x101   : > { %v3432_v36 = vpop.f32.mrf.mxu0  ;;  %2907 = vmatprep.mubr.msk.f32.mxu1 %vm669_vm1, %v3427_v35 }
 0x102   : > { %689 = vst.msk [vmem:[#allocation2 + $0x98] sm:$0xff] %vm669_vm1, %v3432_v36 }
 0x103   : > { %v3438_v37 = vpop.f32.mrf.mxu0 }
 0x104   : > { %687 = vst.msk [vmem:[#allocation2 + $0x88] sm:$0xff] %vm669_vm1, %v3438_v37  ;;  %2908 = vmatmul.mubr.msk.f32.gmra.mxu1 %vm669_vm1, %v3438_v37 }
 0x105   : > { %v2871_v38 = vpop.f32.mrf.mxu0  ;;  %2910 = vmatprep.mubr.msk.f32.mxu1 %vm669_vm1, %v3421_v34 }
 0x106   : > { %692 = vst.msk [vmem:[#allocation2 + $0xb0] sm:$0xff] %vm669_vm1, %v2871_v38 }
 0x107   : > { %v622_v39 = vpop.f32.mrf.mxu0 }
 0x108   : > { %690 = vst.msk [vmem:[#allocation2 + $0xa0] sm:$0xff] %vm669_vm1, %v622_v39  ;;  %2911 = vmatmul.mubr.msk.f32.gmra.mxu1 %vm669_vm1, %v3432_v36 }
 0x109   : > { %v2872_v40 = vpop.f32.mrf.mxu0  ;;  %2913 = vmatprep.mubr.msk.f32.mxu1 %vm669_vm1, %v622_v39 }
 0x10a   : > { %693 = vst.msk [vmem:[#allocation2 + $0xb8] sm:$0xff] %vm669_vm1, %v2872_v40 }
 0x10b   : > { %v625_v41 = vpop.f32.mrf.mxu0 }
 0x10c   : > { %691 = vst.msk [vmem:[#allocation2 + $0xa8] sm:$0xff] %vm669_vm1, %v625_v41  ;;  %2914 = vmatmul.mubr.msk.f32.gmra.mxu1 %vm669_vm1, %v625_v41 }
 0x10d   : > { %v2875_v42 = vpop.f32.mrf.mxu0  ;;  %2916 = vmatprep.mubr.msk.f32.mxu1 %vm669_vm1, %v2871_v38 }
 0x10e   : > { %696 = vst.msk [vmem:[#allocation2 + $0xd0] sm:$0xff] %vm669_vm1, %v2875_v42 }
 0x10f   : > { %v638_v43 = vpop.f32.mrf.mxu0 }
 0x110   : > { %694 = vst.msk [vmem:[#allocation2 + $0xc0] sm:$0xff] %vm669_vm1, %v638_v43  ;;  %2917 = vmatmul.mubr.msk.f32.gmra.mxu1 %vm669_vm1, %v2872_v40 }
 0x111   : > { %v2876_v44 = vpop.f32.mrf.mxu0  ;;  %2919 = vmatprep.mubr.msk.f32.mxu1 %vm669_vm1, %v638_v43 }
 0x112   : > { %697 = vst.msk [vmem:[#allocation2 + $0xd8] sm:$0xff] %vm669_vm1, %v2876_v44 }
 0x113   : > { %v641_v45 = vpop.f32.mrf.mxu0 }
 0x114   : > { %695 = vst.msk [vmem:[#allocation2 + $0xc8] sm:$0xff] %vm669_vm1, %v641_v45  ;;  %2920 = vmatmul.mubr.msk.f32.gmra.mxu1 %vm669_vm1, %v641_v45 }
 0x115   : > { %v2879_v46 = vpop.f32.mrf.mxu0  ;;  %2922 = vmatprep.mubr.msk.f32.mxu1 %vm669_vm1, %v2875_v42 }
 0x116   : > { %700 = vst.msk [vmem:[#allocation2 + $0xf0] sm:$0xff] %vm669_vm1, %v2879_v46 }
 0x117   : > { %v654_v47 = vpop.f32.mrf.mxu0 }
 0x118   : > { %698 = vst.msk [vmem:[#allocation2 + $0xe0] sm:$0xff] %vm669_vm1, %v654_v47  ;;  %2923 = vmatmul.mubr.msk.f32.gmra.mxu1 %vm669_vm1, %v2876_v44 }
 0x119   : > { %v2880_v48 = vpop.f32.mrf.mxu0  ;;  %2925 = vmatprep.mubr.msk.f32.mxu1 %vm669_vm1, %v654_v47 }
 0x11a   : > { %701 = vst.msk [vmem:[#allocation2 + $0xf8] sm:$0xff] %vm669_vm1, %v2880_v48  ;;  %2717 = vmatprep.subr.msk.mxu1 %vm669_vm1, %v2880_v48 }
 0x11b   : > { %v657_v49 = vpop.f32.mrf.mxu0  ;;  %2718 = vmatpush3.xpose.msk.msra.mxu1 %vm669_vm1, %v2864_v32 }
 0x11c   : > { %699 = vst.msk [vmem:[#allocation2 + $0xe8] sm:$0xff] %vm669_vm1, %v657_v49  ;;  %2926 = vmatmul.mubr.msk.f32.gmra.mxu1 %vm669_vm1, %v657_v49  ;;  %2719 = vmatprep.subr.msk.mxu1 %vm669_vm1, %v2879_v46 }
 0x11d   : > { %2928 = vmatprep.mubr.msk.f32.mxu1 %vm669_vm1, %v2879_v46 }
 0x11f   : > { %2720 = vmatpush3.xpose.msk.msra.mxu1 %vm669_vm1, %v3404_v30 }
 0x120   : > { %2929 = vmatmul.mubr.msk.f32.gmra.mxu1 %vm669_vm1, %v2880_v48  ;;  %2721 = vmatprep.subr.msk.mxu1 %vm669_vm1, %v657_v49 }
 0x121   : > { %2749 = vmatprep.mubr.msk.f32.mxu1 %vm669_vm1, %v1057_v50 }
 0x123   : > { %2722 = vmatpush3.xpose.msk.msra.mxu1 %vm669_vm1, %v593_v33 }
 0x124   : > { %2723 = vmatprep.subr.msk.mxu1 %vm669_vm1, %v654_v47 }
 0x127   : > { %2724 = vmatpush3.xpose.msk.msra.mxu1 %vm669_vm1, %v3410_v31 }
 0x128   : > { %2725 = vmatprep.subr.msk.mxu1 %vm669_vm1, %v2876_v44 }
 0x12b   : > { %2726 = vmatpush3.xpose.msk.msra.mxu1 %vm669_vm1, %v3392_v28 }
 0x12c   : > { %2727 = vmatprep.subr.msk.mxu1 %vm669_vm1, %v2875_v42 }
 0x12f   : > { %2728 = vmatpush3.xpose.msk.msra.mxu1 %vm669_vm1, %v3380_v26 }
 0x130   : > { %2729 = vmatprep.subr.msk.mxu1 %vm669_vm1, %v641_v45 }
 0x133   : > { %2730 = vmatpush3.xpose.msk.msra.mxu1 %vm669_vm1, %v3398_v29 }
 0x134   : > { %2731 = vmatprep.subr.msk.mxu1 %vm669_vm1, %v638_v43 }
 0x137   : > { %2732 = vmatpush3.xpose.msk.msra.mxu1 %vm669_vm1, %v3386_v27 }
 0x138   : > { %2733 = vmatprep.subr.msk.mxu1 %vm669_vm1, %v2872_v40 }
 0x13b   : > { %2734 = vmatpush3.xpose.msk.msra.mxu1 %vm669_vm1, %v3368_v24 }
 0x13c   : > { %2735 = vmatprep.subr.msk.mxu1 %vm669_vm1, %v2871_v38 }
 0x13f   : > { %2736 = vmatpush3.xpose.msk.msra.mxu1 %vm669_vm1, %v3356_v22  ;;  %v1138_v22 = vlaneseq }
 0x140   : > { %2737 = vmatprep.subr.msk.mxu1 %vm669_vm1, %v625_v41 }
 0x141   : > { %v1139_v24 = vshrl.u32 %v1138_v22, 7  ;;  %vm1152_vm3 = vcmp.lt.s32.totalorder %v1138_v22, 256 }
 0x143   : > { %2738 = vmatpush3.xpose.msk.msra.mxu1 %vm669_vm1, %v3374_v25 }
 0x144   : > { %2739 = vmatprep.subr.msk.mxu1 %vm669_vm1, %v622_v39 }
 0x147   : > { %2740 = vmatpush3.xpose.msk.msra.mxu1 %vm669_vm1, %v3362_v23 }
 0x148   : > { %2741 = vmatprep.subr.msk.mxu1 %vm669_vm1, %v3432_v36 }
 0x14b   : > { %2742 = vmatpush3.xpose.msk.msra.mxu1 %vm669_vm1, %v3346_v20  ;;  %v3167_v20 = vmov 1966171168  }
 0x14c   : > { %2743 = vmatprep.subr.msk.mxu1 %vm669_vm1, %v3421_v34 }
 0x14f   : > { %2744 = vmatpush3.xpose.msk.msra.mxu1 %vm669_vm1, %v3336_v18 }
 0x150   : > { %2745 = vmatprep.subr.msk.mxu1 %vm669_vm1, %v3438_v37 }
 0x153   : > { %2746 = vmatpush3.xpose.msk.msra.mxu1 %vm669_vm1, %v3350_v21  ;;  %v1136_v21 = vunpack.c.l.s4 %v3167_v20 }
 0x154   : > { %2747 = vmatprep.subr.msk.mxu1 %vm669_vm1, %v3427_v35 }
 0x155   : > { %v1137_v23 = vunpack.c.0.s8 %v1136_v21 }
 0x157   : > { %2748 = vmatpush3.xpose.msk.msra.mxu1 %vm669_vm1, %v3340_v19  ;;  %v1140_v26 = vsub.s32 %v1137_v23, %v1139_v24 }
 0x15a   : > { %2750 = vmatmul.mubr.msk.f32.vlgmr.msra.gmra.mxu1 %vm669_vm1, %v1057_v50 }
 0x1a4   : > { %v2885_v52 = vpop.f32.mrf.mxu1 }
 0x1a5   : > { %1026 = vst.msk [vmem:[#allocation3 + $0x8] sm:$0xff] %vm1024_vm2, %v2885_v52 }
 0x1a6   : > { %v865_v53 = vpop.f32.mrf.mxu1 }
 0x1a7   : > { %1025 = vst.msk [vmem:[#allocation3] sm:$0xff] %vm1024_vm2, %v865_v53 }
 0x1a8   : > { %v2888_v54 = vpop.f32.mrf.mxu1 }
 0x1a9   : > { %1028 = vst.msk [vmem:[#allocation3 + $0x18] sm:$0xff] %vm1024_vm2, %v2888_v54 }
 0x1aa   : > { %v875_v55 = vpop.f32.mrf.mxu1 }
 0x1ab   : > { %1027 = vst.msk [vmem:[#allocation3 + $0x10] sm:$0xff] %vm1024_vm2, %v875_v55 }
 0x1ac   : > { %v2891_v56 = vpop.f32.mrf.mxu1 }
 0x1ad   : > { %1030 = vst.msk [vmem:[#allocation3 + $0x28] sm:$0xff] %vm1024_vm2, %v2891_v56 }
 0x1ae   : > { %v885_v57 = vpop.f32.mrf.mxu1 }
 0x1af   : > { %1029 = vst.msk [vmem:[#allocation3 + $0x20] sm:$0xff] %vm1024_vm2, %v885_v57 }
 0x1b0   : > { %v2894_v58 = vpop.f32.mrf.mxu1 }
 0x1b1   : > { %1032 = vst.msk [vmem:[#allocation3 + $0x38] sm:$0xff] %vm1024_vm2, %v2894_v58 }
 0x1b2   : > { %v895_v59 = vpop.f32.mrf.mxu1 }
 0x1b3   : > { %1031 = vst.msk [vmem:[#allocation3 + $0x30] sm:$0xff] %vm1024_vm2, %v895_v59 }
 0x1b4   : > { %v2897_v60 = vpop.f32.mrf.mxu1 }
 0x1b5   : > { %1034 = vst.msk [vmem:[#allocation3 + $0x48] sm:$0xff] %vm1024_vm2, %v2897_v60 }
 0x1b6   : > { %v905_v61 = vpop.f32.mrf.mxu1 }
 0x1b7   : > { %1033 = vst.msk [vmem:[#allocation3 + $0x40] sm:$0xff] %vm1024_vm2, %v905_v61 }
 0x1b8   : > { %v2900_v62 = vpop.f32.mrf.mxu1 }
 0x1b9   : > { %1036 = vst.msk [vmem:[#allocation3 + $0x58] sm:$0xff] %vm1024_vm2, %v2900_v62 }
 0x1ba   : > { %v915_v63 = vpop.f32.mrf.mxu1 }
 0x1bb   : > { %1035 = vst.msk [vmem:[#allocation3 + $0x50] sm:$0xff] %vm1024_vm2, %v915_v63 }
 0x1bc   : > { %v2903_v0 = vpop.f32.mrf.mxu1 }
 0x1bd   : > { %1038 = vst.msk [vmem:[#allocation3 + $0x68] sm:$0xff] %vm1024_vm2, %v2903_v0 }
 0x1be   : > { %v925_v1 = vpop.f32.mrf.mxu1 }
 0x1bf   : > { %1037 = vst.msk [vmem:[#allocation3 + $0x60] sm:$0xff] %vm1024_vm2, %v925_v1 }
 0x1c0   : > { %v2906_v2 = vpop.f32.mrf.mxu1 }
 0x1c1   : > { %1040 = vst.msk [vmem:[#allocation3 + $0x78] sm:$0xff] %vm1024_vm2, %v2906_v2 }
 0x1c2   : > { %v935_v3 = vpop.f32.mrf.mxu1 }
 0x1c3   : > { %1039 = vst.msk [vmem:[#allocation3 + $0x70] sm:$0xff] %vm1024_vm2, %v935_v3 }
 0x1c4   : > { %v2909_v4 = vpop.f32.mrf.mxu1 }
 0x1c5   : > { %1042 = vst.msk [vmem:[#allocation3 + $0x88] sm:$0xff] %vm1024_vm2, %v2909_v4 }
 0x1c6   : > { %v945_v5 = vpop.f32.mrf.mxu1 }
 0x1c7   : > { %1041 = vst.msk [vmem:[#allocation3 + $0x80] sm:$0xff] %vm1024_vm2, %v945_v5 }
 0x1c8   : > { %v2912_v6 = vpop.f32.mrf.mxu1 }
 0x1c9   : > { %1044 = vst.msk [vmem:[#allocation3 + $0x98] sm:$0xff] %vm1024_vm2, %v2912_v6 }
 0x1ca   : > { %v955_v7 = vpop.f32.mrf.mxu1 }
 0x1cb   : > { %1043 = vst.msk [vmem:[#allocation3 + $0x90] sm:$0xff] %vm1024_vm2, %v955_v7 }
 0x1cc   : > { %v2915_v8 = vpop.f32.mrf.mxu1 }
 0x1cd   : > { %1046 = vst.msk [vmem:[#allocation3 + $0xa8] sm:$0xff] %vm1024_vm2, %v2915_v8 }
 0x1ce   : > { %v965_v9 = vpop.f32.mrf.mxu1 }
 0x1cf   : > { %1045 = vst.msk [vmem:[#allocation3 + $0xa0] sm:$0xff] %vm1024_vm2, %v965_v9 }
 0x1d0   : > { %v2918_v10 = vpop.f32.mrf.mxu1 }
 0x1d1   : > { %1048 = vst.msk [vmem:[#allocation3 + $0xb8] sm:$0xff] %vm1024_vm2, %v2918_v10 }
 0x1d2   : > { %v975_v11 = vpop.f32.mrf.mxu1 }
 0x1d3   : > { %1047 = vst.msk [vmem:[#allocation3 + $0xb0] sm:$0xff] %vm1024_vm2, %v975_v11 }
 0x1d4   : > { %v2921_v12 = vpop.f32.mrf.mxu1 }
 0x1d5   : > { %1050 = vst.msk [vmem:[#allocation3 + $0xc8] sm:$0xff] %vm1024_vm2, %v2921_v12 }
 0x1d6   : > { %v985_v13 = vpop.f32.mrf.mxu1 }
 0x1d7   : > { %1049 = vst.msk [vmem:[#allocation3 + $0xc0] sm:$0xff] %vm1024_vm2, %v985_v13 }
 0x1d8   : > { %v2924_v14 = vpop.f32.mrf.mxu1 }
 0x1d9   : > { %1052 = vst.msk [vmem:[#allocation3 + $0xd8] sm:$0xff] %vm1024_vm2, %v2924_v14 }
 0x1da   : > { %v995_v15 = vpop.f32.mrf.mxu1 }
 0x1db   : > { %1051 = vst.msk [vmem:[#allocation3 + $0xd0] sm:$0xff] %vm1024_vm2, %v995_v15 }
 0x1dc   : > { %v2927_v16 = vpop.f32.mrf.mxu1 }
 0x1dd   : > { %1054 = vst.msk [vmem:[#allocation3 + $0xe8] sm:$0xff] %vm1024_vm2, %v2927_v16 }
 0x1de   : > { %v1005_v17 = vpop.f32.mrf.mxu1 }
 0x1df   : > { %1053 = vst.msk [vmem:[#allocation3 + $0xe0] sm:$0xff] %vm1024_vm2, %v1005_v17 }
 0x1e0   : > { %v2930_v18 = vpop.f32.mrf.mxu1 }
 0x1e1   : > { %1056 = vst.msk [vmem:[#allocation3 + $0xf8] sm:$0xff] %vm1024_vm2, %v2930_v18 }
 0x1e2   : > { %v1015_v19 = vpop.f32.mrf.mxu1 }
 0x1e3   : > { %1055 = vst.msk [vmem:[#allocation3 + $0xf0] sm:$0xff] %vm1024_vm2, %v1015_v19 }
 0x21a   : > { %v1127_v25 = vpop.f32.mrf.mxu1 }
 0x21c   : > { %v1129_v27 = vpop.f32.mrf.mxu1 }
 0x21d   : > { %v1134_v28 = vcombine.low %v1127_v25, %v1129_v27 }
 0x21f   : > { %v1141_v29 = vrot.slane %v1134_v28, %v1140_v26 }
 0x221   : > { %v1148_v30 = vrot.slane %v1141_v29, %v1140_v26 }
 0x223   : > { %1154 = vst.msk [vmem:[#allocation4] sm:$0x3] %vm1152_vm3, %v1148_v30 }
 0x224 PF: > { %s2619_s11 = sshll.u32 %s3148_s21, 6  ;;  %v3168_v31 = vmov 0   ;;  %v3169_v40 = vmov 1.0   ;;  %v1239_v41 = vlaneseq  ;;  %v1297_v42 = vld [vmem:[%s3262_s27] sm:$0xff]  ;;  %v1298_v44 = vld [vmem:[%s3262_s27 + $0x8] sm:$0xff]  ;;  %v3599_v55 = vld [vmem:[%s3262_s27 + $0x10] sm:$0xff] }
 0x225   : > { %3075 = vset.pattern.permute.xlu1 %v3168_v31  ;;  %3074 = vset.pattern.permute.xlu0 %v3168_v31  ;;  %s1188_s15 = scalar_lea.vmem [#allocation3], %s2619_s11  ;;  %v1301_v45 = vunpack.c.0.s8 %v1297_v42  ;;  %v1305_v46 = vunpack.c.2.s8 %v1297_v42  ;;  %v1302_v49 = vunpack.c.0.s8 %v1298_v44  ;;  %v1306_v51 = vunpack.c.2.s8 %v1298_v44  ;;  %v3610_v60 = vld [vmem:[%s3262_s27 + $0x18] sm:$0xff]  ;;  %p2660_p8 = scmp.ne.s32.totalorder %s3148_s21, 3 }
 0x226   : > { %v1191_v32 = vld [vmem:[%s1188_s15 + $0x10] sm:$0xff]  ;;  %v1189_v33 = vld [vmem:[%s1188_s15] sm:$0xff]  ;;  %v1192_v34 = vld [vmem:[%s1188_s15 + $0x18] sm:$0xff]  ;;  %2751 = vmatprep.subr.mxu0 %v3169_v40  ;;  %v1240_v43 = vshrl.u32 %v1239_v41, 7  ;;  %v1303_v53 = vunpack.c.1.s8 %v1297_v42  ;;  %v1304_v54 = vunpack.c.1.s8 %v1298_v44  ;;  %v1307_v62 = vunpack.c.3.s8 %v1297_v42 }
 0x227   : > { %1210 = vperm.xlu1 %3075, %v1191_v32   ;;  %1200 = vperm.xlu0 %3074, %v1189_v33   ;;  %v1190_v35 = vld [vmem:[%s1188_s15 + $0x8] sm:$0xff]  ;;  %v1193_v37 = vld [vmem:[%s1188_s15 + $0x20] sm:$0xff]  ;;  %v1196_v38 = vld [vmem:[%s1188_s15 + $0x38] sm:$0xff]  ;;  %v3596_v52 = vcvt.s32.f32 %v1301_v45  ;;  %v3601_v56 = vcvt.s32.f32 %v1305_v46  ;;  %v3607_v59 = vcvt.s32.f32 %v1302_v49  ;;  %v3612_v61 = vcvt.s32.f32 %v1306_v51 }
 0x228   : > { %v1194_v36 = vld [vmem:[%s1188_s15 + $0x28] sm:$0xff]  ;;  %v1195_v39 = vld [vmem:[%s1188_s15 + $0x30] sm:$0xff]  ;;  %2752 = vmatpush3.msra.mxu0 %v3169_v40  ;;  %v1241_v47 = vsub.s32 0, %v1240_v43  ;;  %v1245_v48 = vsub.s32 1, %v1240_v43  ;;  %v1308_v63 = vunpack.c.3.s8 %v1298_v44  ;;  %v1309_v0 = vunpack.c.0.s8 %v3599_v55 }
 0x229   : > { %2753 = vmatprep.subr.mxu0 %v3169_v40  ;;  %vm1333_vm4 = vcmp.gt.f32.partialorder %v3596_v52, 0.0  ;;  %v3616_v1 = vcvt.s32.f32 %v1303_v53  ;;  %v3618_v2 = vcvt.s32.f32 %v1304_v54  ;;  %vm1337_vm5 = vcmp.gt.f32.partialorder %v3601_v56, 0.0 }
 0x22a   : > { %2754 = vmatpush3.msra.mxu0 %v3169_v40  ;;  %v1197_v50 = vld [vmem:[#allocation4] sm:$0x3]  ;;  %v1310_v5 = vunpack.c.0.s8 %v3610_v60  ;;  %v1311_v6 = vunpack.c.1.s8 %v3599_v55  ;;  %v1312_v7 = vunpack.c.1.s8 %v3610_v60  ;;  %vm1334_vm6 = vcmp.gt.f32.partialorder %v3607_v59, 0.0 }
 0x22b   : > { %1215 = vperm.xlu1 %3075, %v1192_v34   ;;  %1205 = vperm.xlu0 %3074, %v1190_v35   ;;  %v3603_v57 = vrot.slane %v1197_v50, %v1241_v47  ;;  %v3605_v58 = vrot.slane %v1197_v50, %v1245_v48  ;;  %vm1338_vm7 = vcmp.gt.f32.partialorder %v3612_v61, 0.0  ;;  %v3630_v12 = vcvt.s32.f32 %v1307_v62 }
 0x22c   : > { %2755 = vmatprep.subr.mxu0 %v3169_v40  ;;  %v3632_v13 = vcvt.s32.f32 %v1308_v63  ;;  %v3634_v14 = vcvt.s32.f32 %v1309_v0  ;;  %v1313_v18 = vunpack.c.2.s8 %v3599_v55  ;;  %vm1335_vm8 = vcmp.gt.f32.partialorder %v3616_v1, 0.0 }
 0x22d   : > { %2756 = vmatpush3.msra.mxu0 %v3169_v40  ;;  %vm1336_vm9 = vcmp.gt.f32.partialorder %v3618_v2, 0.0  ;;  %v3639_v22 = vcvt.s32.f32 %v1310_v5  ;;  %v3641_v23 = vcvt.s32.f32 %v1311_v6  ;;  %v3643_v24 = vcvt.s32.f32 %v1312_v7 }
 0x22e   : > { %2757 = vmatprep.subr.mxu0 %v3169_v40  ;;  %v1314_v27 = vunpack.c.2.s8 %v3610_v60  ;;  %v1315_v28 = vunpack.c.3.s8 %v3599_v55  ;;  %vm1339_vm10 = vcmp.gt.f32.partialorder %v3630_v12, 0.0  ;;  %vm1340_vm11 = vcmp.gt.f32.partialorder %v3632_v13, 0.0 }
 0x22f   : > { %1225 = vperm.xlu1 %3075, %v1194_v36   ;;  %1220 = vperm.xlu0 %3074, %v1193_v37   ;;  %v3658_v35 = vcvt.s32.f32 %v1313_v18  ;;  %v1316_v36 = vunpack.c.3.s8 %v3610_v60  ;;  %vm1341_vm12 = vcmp.gt.f32.partialorder %v3634_v14, 0.0  ;;  %vm1342_vm13 = vcmp.gt.f32.partialorder %v3639_v22, 0.0 }
 0x230   : > { %2758 = vmatpush3.msra.mxu0 %v3169_v40  ;;  %v1330_v46 = vcvt.s32.f32 %v1314_v27  ;;  %v1331_v50 = vcvt.s32.f32 %v1315_v28  ;;  %vm1343_vm14 = vcmp.gt.f32.partialorder %v3641_v23, 0.0  ;;  %vm1344_vm15 = vcmp.gt.f32.partialorder %v3643_v24, 0.0 }
 0x231   : > { %2759 = vmatprep.subr.mxu0 %v3169_v40  ;;  %vm1345_vm0 = vcmp.gt.f32.partialorder %v3658_v35, 0.0  ;;  %v1332_v28 = vcvt.s32.f32 %v1316_v36 }
 0x232   : > { %2760 = vmatpush3.msra.mxu0 %v3169_v40  ;;  %vm1346_vm1 = vcmp.gt.f32.partialorder %v1330_v46, 0.0  ;;  %vm1347_vm2 = vcmp.gt.f32.partialorder %v1331_v50, 0.0 }
 0x233   : > { %1235 = vperm.xlu1 %3075, %v1196_v38   ;;  %1230 = vperm.xlu0 %3074, %v1195_v39   ;;  %vm1348_vm3 = vcmp.gt.f32.partialorder %v1332_v28, 0.0 }
 0x234   : > { %2761 = vmatprep.subr.mxu0 %v3169_v40 }
 0x235   : > { %2762 = vmatpush3.msra.mxu0 %v3169_v40 }
 0x236   : > { %2763 = vmatprep.subr.mxu0 %v3169_v40 }
 0x237   : > { %2764 = vmatpush3.msra.mxu0 %v3169_v40 }
 0x238   : > { %2765 = vmatprep.subr.mxu0 %v3169_v40 }
 0x239   : > { %2766 = vmatpush3.msra.mxu0 %v3169_v40 }
 0x23a   : > { %2767 = vmatprep.subr.mxu0 %v3169_v40 }
 0x23b   : > { %2768 = vmatpush3.msra.mxu0 %v3169_v40 }
 0x23c   : > { %2769 = vmatprep.subr.mxu0 %v3169_v40 }
 0x23d   : > { %2770 = vmatpush3.msra.mxu0 %v3169_v40 }
 0x23e   : > { %2771 = vmatprep.subr.mxu0 %v3169_v40 }
 0x23f   : > { %2772 = vmatpush3.msra.mxu0 %v3169_v40 }
 0x240   : > { %2773 = vmatprep.subr.mxu0 %v3169_v40 }
 0x241   : > { %2774 = vmatpush3.msra.mxu0 %v3169_v40 }
 0x242   : > { %2775 = vmatprep.subr.mxu0 %v3169_v40 }
 0x243   : > { %2776 = vmatpush3.msra.mxu0 %v3169_v40 }
 0x244   : > { %2777 = vmatprep.subr.mxu0 %v3169_v40 }
 0x245   : > { %2778 = vmatpush3.msra.mxu0 %v3169_v40 }
 0x246   : > { %2779 = vmatprep.subr.mxu0 %v3169_v40 }
 0x247   : > { %2780 = vmatpush3.msra.mxu0 %v3169_v40 }
 0x248   : > { %2781 = vmatprep.subr.mxu0 %v3169_v40 }
 0x249   : > { %2782 = vmatpush3.msra.mxu0 %v3169_v40 }
 0x2a2   : > { %v1211_v3 = vpop.permute.xlu1 %1210  ;;  %v1201_v4 = vpop.permute.xlu0 %1200 }
 0x2a3   : > { %v1253_v8 = vadd.f32 %v3603_v57, %v1211_v3  ;;  %v1254_v9 = vadd.f32 %v3605_v58, %v1211_v3  ;;  %v1249_v10 = vadd.f32 %v3603_v57, %v1201_v4  ;;  %v1250_v11 = vadd.f32 %v3605_v58, %v1201_v4 }
 0x2a5   : > { %v1269_v15 = vmul.f32 0.2, %v1253_v8  ;;  %v1270_v16 = vmul.f32 0.2, %v1254_v9  ;;  %v1265_v17 = vmul.f32 0.2, %v1249_v10 }
 0x2a6   : > { %v1266_v19 = vmul.f32 0.2, %v1250_v11  ;;  %v1216_v20 = vpop.permute.xlu1 %1215  ;;  %v1206_v21 = vpop.permute.xlu0 %1205 }
 0x2a7   : > { %v1285_v25 = vmax.f32 %v1253_v8, %v1269_v15  ;;  %v3646_v26 = vadd.f32 %v3603_v57, %v1216_v20  ;;  %v1281_v29 = vmax.f32 %v1249_v10, %v1265_v17  ;;  %v3651_v30 = vadd.f32 %v3605_v58, %v1216_v20 }
 0x2a8   : > { %v1251_v31 = vadd.f32 %v3603_v57, %v1206_v21  ;;  %v1252_v32 = vadd.f32 %v3605_v58, %v1206_v21  ;;  %v1286_v33 = vmax.f32 %v1254_v9, %v1270_v16  ;;  %v1282_v37 = vmax.f32 %v1250_v11, %v1266_v19 }
 0x2a9   : > { %v1271_v34 = vmul.f32 0.2, %v3646_v26  ;;  %v1272_v38 = vmul.f32 0.2, %v3651_v30  ;;  %v3670_v48 = vsel %vm1333_vm4, %v1281_v29, -1e+30 }
 0x2aa   : > { %v1267_v39 = vmul.f32 0.2, %v1251_v31  ;;  %v1268_v40 = vmul.f32 0.2, %v1252_v32  ;;  %v1226_v41 = vpop.permute.xlu1 %1225  ;;  %v1221_v42 = vpop.permute.xlu0 %1220  ;;  %v3674_v49 = vsel %vm1337_vm5, %v1285_v25, -1e+30 }
 0x2ab   : > { %v1259_v43 = vadd.f32 %v3603_v57, %v1226_v41  ;;  %v1260_v44 = vadd.f32 %v3605_v58, %v1226_v41  ;;  %v1257_v45 = vadd.f32 %v3603_v57, %v1221_v42  ;;  %v1258_v47 = vadd.f32 %v3605_v58, %v1221_v42 }
 0x2ac   : > { %v1287_v51 = vmax.f32 %v3646_v26, %v1271_v34  ;;  %v1283_v53 = vmax.f32 %v1251_v31, %v1267_v39  ;;  %v1284_v54 = vmax.f32 %v1252_v32, %v1268_v40  ;;  %v1288_v60 = vmax.f32 %v3651_v30, %v1272_v38 }
 0x2ad   : > { %v1273_v55 = vmul.f32 0.2, %v1257_v45  ;;  %v1274_v62 = vmul.f32 0.2, %v1258_v47  ;;  %v1350_v52 = vsel %vm1334_vm6, %v1282_v37, -1e+30 }
 0x2ae   : > { %v1236_v63 = vpop.permute.xlu1 %1235  ;;  %v1231_v56 = vpop.permute.xlu0 %1230  ;;  %v3684_v0 = vsel %vm1338_vm7, %v1286_v33, -1e+30  ;;  %v1275_v3 = vmul.f32 0.2, %v1259_v43  ;;  %v1276_v4 = vmul.f32 0.2, %v1260_v44  ;;  %v1365_v6 = vmax.f32 %v3670_v48, %v1350_v52 }
 0x2af   : > { %v1289_v5 = vmax.f32 %v1257_v45, %v1273_v55  ;;  %v1290_v7 = vmax.f32 %v1258_v47, %v1274_v62  ;;  %v1263_v8 = vadd.f32 %v3603_v57, %v1236_v63  ;;  %v1264_v9 = vadd.f32 %v3605_v58, %v1236_v63 }
 0x2b0   : > { %v1261_v10 = vadd.f32 %v3603_v57, %v1231_v56  ;;  %1366 = vmax.xlane.f32.xlu0 %v1365_v6  ;;  %v1262_v59 = vadd.f32 %v3605_v58, %v1231_v56  ;;  %v1371_v61 = vmax.f32 %v3674_v49, %v3684_v0  ;;  %v1351_v11 = vsel %vm1335_vm8, %v1283_v53, -1e+30 }
 0x2b1   : > { %v1352_v15 = vsel %vm1336_vm9, %v1284_v54, -1e+30  ;;  %v1291_v18 = vmax.f32 %v1259_v43, %v1275_v3  ;;  %v1292_v19 = vmax.f32 %v1260_v44, %v1276_v4  ;;  %v1279_v57 = vmul.f32 0.2, %v1263_v8 }
 0x2b2   : > { %v1277_v16 = vmul.f32 0.2, %v1261_v10  ;;  %v1368_v17 = vmax.f32 %v1351_v11, %v1352_v15  ;;  %v1278_v20 = vmul.f32 0.2, %v1262_v59  ;;  %v1280_v21 = vmul.f32 0.2, %v1264_v9 }
 0x2b3   : > { %v1355_v25 = vsel %vm1339_vm10, %v1287_v51, -1e+30  ;;  %v1356_v1 = vsel %vm1340_vm11, %v1288_v60, -1e+30  ;;  %v1357_v26 = vsel %vm1341_vm12, %v1289_v5, -1e+30  ;;  %v1295_v31 = vmax.f32 %v1263_v8, %v1279_v57 }
 0x2b4   : > { %v1293_v58 = vmax.f32 %v1261_v10, %v1277_v16  ;;  %1369 = vmax.xlane.f32.xlu1 %v1368_v17  ;;  %v1294_v2 = vmax.f32 %v1262_v59, %v1278_v20  ;;  %1372 = vmax.xlane.f32.xlu0 %v1371_v61  ;;  %v1358_v27 = vsel %vm1342_vm13, %v1290_v7, -1e+30  ;;  %v1374_v12 = vmax.f32 %v1355_v25, %v1356_v1 }
 0x2b5   : > { %v1377_v29 = vmax.f32 %v1357_v26, %v1358_v27  ;;  %v1296_v13 = vmax.f32 %v1264_v9, %v1280_v21  ;;  %v1359_v14 = vsel %vm1343_vm14, %v1291_v18, -1e+30  ;;  %v1360_v22 = vsel %vm1344_vm15, %v1292_v19, -1e+30 }
 0x2b6   : > { %v3708_v30 = vsel %vm1345_vm0, %v1293_v58, -1e+30  ;;  %v3711_v32 = vsel %vm1346_vm1, %v1294_v2, -1e+30  ;;  %v1380_v34 = vmax.f32 %v1359_v14, %v1360_v22  ;;  %v3719_v35 = vsel %vm1347_vm2, %v1295_v31, -1e+30 }
 0x2b7   : > { %v1383_v33 = vmax.f32 %v3708_v30, %v3711_v32  ;;  %v3721_v36 = vsel %vm1348_vm3, %v1296_v13, -1e+30  ;;  %vm1678_vm4 = vcmask 523264   ;;  %vm2032_vm13 = vcmask 7168  }
 0x2b8   : > { %1378 = vmax.xlane.f32.xlu1 %v1377_v29  ;;  %1375 = vmax.xlane.f32.xlu0 %v1374_v12  ;;  %v1386_v23 = vmax.f32 %v3719_v35, %v3721_v36 }
 0x2bc   : > { %1384 = vmax.xlane.f32.xlu1 %v1383_v33  ;;  %1381 = vmax.xlane.f32.xlu0 %v1380_v34 }
 0x2c0   : > { %1387 = vmax.xlane.f32.xlu0 %v1386_v23 }
 0x339   : > { %v3725_v37 = vpop.xlane.xlu0 %1366 }
 0x33a   : > { %v1389_v24 = vsub.f32 %v3670_v48, %v3725_v37  ;;  %v1390_v38 = vsub.f32 %v1350_v52, %v3725_v37  ;;  %vm1542_vm12 = vcmp.gt.f32.partialorder %v3725_v37, -1e+29 }
 0x33c   : > { %v1405_v39 = vmul.f32 1.442695, %v1389_v24  ;;  %v1407_v40 = vmul.f32 1.442695, %v1390_v38 }
 0x33d   : > { %v3730_v41 = vpop.xlane.xlu1 %1369  ;;  %v3734_v44 = vpop.xlane.xlu0 %1372 }
 0x33e   : > { %v1391_v42 = vsub.f32 %v1351_v11, %v3730_v41  ;;  %v1392_v43 = vsub.f32 %v1352_v15, %v3730_v41  ;;  %3076 = vpow2.f32 %v1405_v39  ;;  %v1393_v45 = vsub.f32 %v3674_v49, %v3734_v44 }
 0x33f   : > { %v1394_v46 = vsub.f32 %v3684_v0, %v3734_v44  ;;  %3078 = vpow2.f32 %v1407_v40  ;;  %vm1544_vm10 = vcmp.gt.f32.partialorder %v3734_v44, -1e+29  ;;  %vm1543_vm11 = vcmp.gt.f32.partialorder %v3730_v41, -1e+29 }
 0x340   : > { %v1409_v47 = vmul.f32 1.442695, %v1391_v42  ;;  %v1411_v48 = vmul.f32 1.442695, %v1392_v43  ;;  %v1413_v53 = vmul.f32 1.442695, %v1393_v45 }
 0x341   : > { %v1415_v50 = vmul.f32 1.442695, %v1394_v46  ;;  %v3740_v51 = vpop.xlane.xlu0 %1375  ;;  %v3742_v54 = vpop.xlane.xlu1 %1378 }
 0x342   : > { %3080 = vpow2.f32 %v1409_v47  ;;  %v1395_v55 = vsub.f32 %v1355_v25, %v3740_v51  ;;  %v1396_v60 = vsub.f32 %v1356_v1, %v3740_v51  ;;  %v1398_v49 = vsub.f32 %v1358_v27, %v3742_v54 }
 0x343   : > { %3082 = vpow2.f32 %v1411_v48  ;;  %v1397_v52 = vsub.f32 %v1357_v26, %v3742_v54  ;;  %vm1546_vm8 = vcmp.gt.f32.partialorder %v3742_v54, -1e+29  ;;  %vm1545_vm9 = vcmp.gt.f32.partialorder %v3740_v51, -1e+29 }
 0x344   : > { %3084 = vpow2.f32 %v1415_v50  ;;  %v1419_v62 = vmul.f32 1.442695, %v1396_v60  ;;  %v1417_v63 = vmul.f32 1.442695, %v1395_v55  ;;  %v1423_v0 = vmul.f32 1.442695, %v1398_v49 }
 0x345   : > { %3086 = vpow2.f32 %v1413_v53  ;;  %v3748_v56 = vpop.xlane.xlu0 %1381  ;;  %v1421_v4 = vmul.f32 1.442695, %v1397_v52  ;;  %v3751_v5 = vpop.xlane.xlu1 %1384 }
 0x346   : > { %3088 = vpow2.f32 %v1419_v62  ;;  %v1400_v3 = vsub.f32 %v1360_v22, %v3748_v56  ;;  %v1399_v6 = vsub.f32 %v1359_v14, %v3748_v56  ;;  %v1402_v9 = vsub.f32 %v3711_v32, %v3751_v5 }
 0x347   : > { %3090 = vpow2.f32 %v1417_v63  ;;  %v1401_v61 = vsub.f32 %v3708_v30, %v3751_v5  ;;  %vm1548_vm6 = vcmp.gt.f32.partialorder %v3751_v5, -1e+29  ;;  %vm1547_vm7 = vcmp.gt.f32.partialorder %v3748_v56, -1e+29 }
 0x348   : > { %3092 = vpow2.f32 %v1423_v0  ;;  %v1427_v10 = vmul.f32 1.442695, %v1400_v3  ;;  %v1425_v11 = vmul.f32 1.442695, %v1399_v6  ;;  %v1431_v17 = vmul.f32 1.442695, %v1402_v9 }
 0x349   : > { %3094 = vpow2.f32 %v1421_v4  ;;  %v3758_v15 = vpop.xlane.xlu0 %1387  ;;  %v1429_v57 = vmul.f32 1.442695, %v1401_v61 }
 0x34a   : > { %3096 = vpow2.f32 %v1427_v10  ;;  %v1404_v18 = vsub.f32 %v3721_v36, %v3758_v15  ;;  %v1403_v20 = vsub.f32 %v3719_v35, %v3758_v15  ;;  %vm1549_vm5 = vcmp.gt.f32.partialorder %v3758_v15, -1e+29 }
 0x34b   : > { %v3077_v7 = vpop.eup %3076  ;;  %3098 = vpow2.f32 %v1425_v11 }
 0x34c   : > { %v3079_v8 = vpop.eup %3078  ;;  %1614 = vxpose.xlu1.b32.start [1/8] (short) %v3077_v7, 128  ;;  %3100 = vpow2.f32 %v1431_v17  ;;  %v1435_v58 = vmul.f32 1.442695, %v1404_v18  ;;  %v1433_v1 = vmul.f32 1.442695, %v1403_v20  ;;  %v3170_v18 = vmov 0.0  }
 0x34d   : > { %1646 = vxpose.xlu0.b32.start [1/8] (short) %v3079_v8, 128  ;;  %1501 = vmatprep.mubr.f32.mxu0 %v3079_v8  ;;  %3102 = vpow2.f32 %v1429_v57  ;;  %v2625_v5 = vsel %vm1547_vm7, 1.0, %v3170_v18 }
 0x34e   : > { %1502 = vmatmul.mubr.f32.vlgmr.msra.gmra.mxu0 %v3077_v7  ;;  %3104 = vpow2.f32 %v1435_v58  ;;  %v2626_v58 = vsel %vm1548_vm6, 1.0, %v3170_v18 }
 0x34f   : > { %v3081_v59 = vpop.eup %3080  ;;  %3106 = vpow2.f32 %v1433_v1 }
 0x350   : > { %v3083_v16 = vpop.eup %3082  ;;  %1615 = vxpose.xlu1.b32.cont [2/8] (short) %v3081_v59, 128 }
 0x351   : > { %1506 = vmatprep.mubr.f32.mxu0 %v3083_v16  ;;  %1647 = vxpose.xlu0.b32.cont [2/8] (short) %v3083_v16, 128  ;;  %v3085_v19 = vpop.eup %3084 }
 0x352   : > { %1507 = vmatmul.mubr.f32.gmra.mxu0 %v3081_v59  ;;  %v3087_v21 = vpop.eup %3086 }
 0x353   : > { %1511 = vmatprep.mubr.f32.mxu0 %v3085_v19  ;;  %v3089_v25 = vpop.eup %3088 }
 0x354   : > { %1616 = vxpose.xlu1.b32.cont [3/8] (short) %v3087_v21, 128  ;;  %v3091_v2 = vpop.eup %3090 }
 0x355   : > { %1648 = vxpose.xlu0.b32.cont [3/8] (short) %v3085_v19, 128  ;;  %v3093_v26 = vpop.eup %3092  ;;  %v2627_v19 = vsel %vm1549_vm5, 1.0, %v3170_v18 }
 0x356   : > { %1512 = vmatmul.mubr.f32.gmra.mxu0 %v3087_v21  ;;  %v3095_v27 = vpop.eup %3094 }
 0x357   : > { %1516 = vmatprep.mubr.f32.mxu0 %v3089_v25  ;;  %v3097_v28 = vpop.eup %3096 }
 0x358   : > { %1617 = vxpose.xlu1.b32.cont [4/8] (short) %v3091_v2, 128  ;;  %v3099_v29 = vpop.eup %3098 }
 0x359   : > { %1649 = vxpose.xlu0.b32.cont [4/8] (short) %v3089_v25, 128  ;;  %v3101_v30 = vpop.eup %3100 }
 0x35a   : > { %1517 = vmatmul.mubr.f32.gmra.mxu0 %v3091_v2  ;;  %v3103_v31 = vpop.eup %3102 }
 0x35b   : > { %1521 = vmatprep.mubr.f32.mxu0 %v3093_v26  ;;  %v3105_v12 = vpop.eup %3104 }
 0x35c   : > { %1618 = vxpose.xlu1.b32.cont [5/8] (short) %v3095_v27, 128  ;;  %v3107_v32 = vpop.eup %3106 }
 0x35d   : > { %1650 = vxpose.xlu0.b32.cont [5/8] (short) %v3093_v26, 128  ;;  %v2624_v26 = vsel %vm1546_vm8, 1.0, %v3170_v18 }
 0x35e   : > { %1522 = vmatmul.mubr.f32.gmra.mxu0 %v3095_v27 }
 0x35f   : > { %1526 = vmatprep.mubr.f32.mxu0 %v3097_v28 }
 0x360   : > { %1619 = vxpose.xlu1.b32.cont [6/8] (short) %v3099_v29, 128 }
 0x361   : > { %1651 = vxpose.xlu0.b32.cont [6/8] (short) %v3097_v28, 128 }
 0x362   : > { %1527 = vmatmul.mubr.f32.gmra.mxu0 %v3099_v29  ;;  %v2623_v29 = vsel %vm1545_vm9, 1.0, %v3170_v18 }
 0x363   : > { %1531 = vmatprep.mubr.f32.mxu0 %v3101_v30 }
 0x364   : > { %1620 = vxpose.xlu1.b32.cont [7/8] (short) %v3103_v31, 128 }
 0x365   : > { %1652 = vxpose.xlu0.b32.cont [7/8] (short) %v3101_v30, 128 }
 0x366   : > { %1532 = vmatmul.mubr.f32.gmra.mxu0 %v3103_v31 }
 0x367   : > { %1536 = vmatprep.mubr.f32.mxu0 %v3105_v12 }
 0x368   : > { %1621 = vxpose.xlu1.b32.end [8/8] (short) %v3107_v32, 128 }
 0x369   : > { %1653 = vxpose.xlu0.b32.end [8/8] (short) %v3105_v12, 128  ;;  %v2622_v12 = vsel %vm1544_vm10, 1.0, %v3170_v18 }
 0x36a   : > { %1537 = vmatmul.mubr.f32.gmra.mxu0 %v3107_v32 }
 0x3c8   : > { %v1630_v13 = vpop.trf.xlu1 }
 0x3c9   : > { %2947 = vmatprep.mubr.msk.f32.mxu0 %vm1678_vm4, %v1630_v13  ;;  %v3774_v53 = vpop.trf.xlu0  ;;  %v2621_v13 = vsel %vm1543_vm11, 1.0, %v3170_v18 }
 0x3cc   : > { %v3765_v14 = vpop.trf.xlu1 }
 0x3cd   : > { %v3778_v63 = vpop.trf.xlu0 }
 0x3d0   : > { %v3767_v22 = vpop.trf.xlu1 }
 0x3d1   : > { %v3782_v8 = vpop.trf.xlu0 }
 0x3d4   : > { %v3769_v33 = vpop.trf.xlu1 }
 0x3d5   : > { %v3786_v11 = vpop.trf.xlu0 }
 0x3d8   : > { %v1634_v34 = vpop.trf.xlu1 }
 0x3d9   : > { %2953 = vmatprep.mubr.msk.f32.mxu1 %vm1678_vm4, %v1634_v34  ;;  %v3793_v25 = vpop.trf.xlu0 }
 0x3dc   : > { %v3772_v48 = vpop.trf.xlu1 }
 0x3dd   : > { %v3798_v30 = vpop.trf.xlu0 }
 0x3e0   : > { %v3776_v62 = vpop.trf.xlu1 }
 0x3e4   : > { %v3780_v6 = vpop.trf.xlu1 }
 0x3e8   : > { %v3784_v59 = vpop.trf.xlu1 }
 0x3ec   : > { %v3790_v57 = vpop.trf.xlu1 }
 0x3f0   : > { %v1640_v27 = vpop.trf.xlu1 }
 0x3f4   : > { %v1641_v34 = vpop.trf.xlu1 }
 0x3f8   : > { %v1642_v37 = vpop.trf.xlu1 }
 0x40e   : > { %v2783_v35 = vpop.f32.mrf.mxu0 }
 0x410   : > { %v2784_v36 = vpop.f32.mrf.mxu0 }
 0x411   : > { %v2785_v61 = vadd.f32 %v2784_v36, %v2783_v35  ;;  %v2620_v35 = vsel %vm1542_vm12, 1.0, %v3170_v18  ;;  %v1668_v36 = vpop.trf.xlu0  ;;  %v1591_v18 = vld [vmem:[#allocation5 + $0x48] sm:$0xff] }
 0x412   : > { %v2786_v23 = vpop.f32.mrf.mxu0 }
 0x414   : > { %v2787_v24 = vpop.f32.mrf.mxu0 }
 0x415   : > { %v2788_v10 = vadd.f32 %v2787_v24, %v2786_v23  ;;  %v1669_v24 = vpop.trf.xlu0 }
 0x416   : > { %v2789_v38 = vpop.f32.mrf.mxu0 }
 0x418   : > { %v2790_v39 = vpop.f32.mrf.mxu0 }
 0x419   : > { %v2791_v9 = vadd.f32 %v2790_v39, %v2789_v38  ;;  %v1670_v38 = vpop.trf.xlu0 }
 0x41a   : > { %v2792_v40 = vpop.f32.mrf.mxu0 }
 0x41c   : > { %v2793_v42 = vpop.f32.mrf.mxu0 }
 0x41d   : > { %v2794_v7 = vadd.f32 %v2793_v42, %v2792_v40  ;;  %v1671_v39 = vpop.trf.xlu0 }
 0x41e   : > { %v2795_v43 = vpop.f32.mrf.mxu0 }
 0x420   : > { %v2796_v45 = vpop.f32.mrf.mxu0 }
 0x421   : > { %v2797_v4 = vadd.f32 %v2796_v45, %v2795_v43  ;;  %v1672_v40 = vpop.trf.xlu0 }
 0x422   : > { %v2798_v46 = vpop.f32.mrf.mxu0 }
 0x424   : > { %v2799_v47 = vpop.f32.mrf.mxu0 }
 0x425   : > { %v2800_v0 = vadd.f32 %v2799_v47, %v2798_v46  ;;  %v1673_v42 = vpop.trf.xlu0 }
 0x426   : > { %v2801_v50 = vpop.f32.mrf.mxu0 }
 0x428   : > { %v2802_v55 = vpop.f32.mrf.mxu0 }
 0x429   : > { %v2803_v60 = vadd.f32 %v2802_v55, %v2801_v50  ;;  %v1674_v43 = vpop.trf.xlu0  ;;  %v1587_v50 = vld [vmem:[#allocation5 + $0x28] sm:$0xff] }
 0x42a   : > { %v2804_v49 = vpop.f32.mrf.mxu0 }
 0x42b   : > { %3108 = vrcp.f32 %v2803_v60  ;;  %v1582_v60 = vld [vmem:[#allocation5] sm:$0xff] }
 0x42c   : > { %v2805_v52 = vpop.f32.mrf.mxu0 }
 0x42d   : > { %v2806_v3 = vadd.f32 %v2805_v52, %v2804_v49  ;;  %v1675_v45 = vpop.trf.xlu0  ;;  %v1586_v49 = vld [vmem:[#allocation5 + $0x20] sm:$0xff] }
 0x42f   : > { %3110 = vrcp.f32 %v2806_v3  ;;  %v1585_v3 = vld [vmem:[#allocation5 + $0x18] sm:$0xff] }
 0x430   : > { %3112 = vrcp.f32 %v2800_v0 }
 0x431   : > { %3114 = vrcp.f32 %v2797_v4  ;;  %v1676_v46 = vpop.trf.xlu0  ;;  %v1589_v4 = vld [vmem:[#allocation5 + $0x38] sm:$0xff] }
 0x432   : > { %3116 = vrcp.f32 %v2794_v7 }
 0x433   : > { %3118 = vrcp.f32 %v2791_v9 }
 0x434   : > { %3120 = vrcp.f32 %v2788_v10  ;;  %v1584_v10 = vld [vmem:[#allocation5 + $0x10] sm:$0xff] }
 0x435   : > { %3122 = vrcp.f32 %v2785_v61  ;;  %v1677_v47 = vpop.trf.xlu0 }
 0x438   : > { %v3109_v16 = vpop.eup %3108 }
 0x439   : > { %v1580_v15 = vmul.f32 %v3109_v16, %v2626_v58 }
 0x43c   : > { %v3111_v17 = vpop.eup %3110 }
 0x43d   : > { %v1581_v20 = vmul.f32 %v3111_v17, %v2627_v19  ;;  %v3113_v21 = vpop.eup %3112 }
 0x43e   : > { %v3115_v1 = vpop.eup %3114  ;;  %v1579_v2 = vmul.f32 %v3113_v21, %v2625_v5  ;;  %v1590_v21 = vld [vmem:[#allocation5 + $0x40] sm:$0xff] }
 0x43f   : > { %2931 = vmatprep.subr.mxu0 %v1581_v20  ;;  %2995 = vmatprep.subr.mxu1 %v1581_v20  ;;  %v3117_v56 = vpop.eup %3116  ;;  %v1578_v54 = vmul.f32 %v3115_v1, %v2624_v26 }
 0x440   : > { %2932 = vmatpush3.msra.mxu0 %v1581_v20  ;;  %3003 = vmatpush3.msra.mxu1 %v1581_v20  ;;  %v3119_v28 = vpop.eup %3118  ;;  %v1577_v51 = vmul.f32 %v3117_v56, %v2623_v29  ;;  %v1594_v29 = vld [vmem:[#allocation5 + $0x60] sm:$0xff] }
 0x441   : > { %2933 = vmatprep.subr.mxu0 %v1580_v15  ;;  %2996 = vmatprep.subr.mxu1 %v1580_v15  ;;  %v3121_v31 = vpop.eup %3120  ;;  %v1576_v44 = vmul.f32 %v3119_v28, %v2622_v12 }
 0x442   : > { %2934 = vmatpush3.msra.mxu0 %v1580_v15  ;;  %3004 = vmatpush3.msra.mxu1 %v1580_v15  ;;  %v3123_v32 = vpop.eup %3122  ;;  %v1575_v41 = vmul.f32 %v3121_v31, %v2621_v13  ;;  %v1593_v15 = vld [vmem:[#allocation5 + $0x58] sm:$0xff] }
 0x443   : > { %2935 = vmatprep.subr.mxu0 %v1579_v2  ;;  %2997 = vmatprep.subr.mxu1 %v1579_v2  ;;  %v1574_v23 = vmul.f32 %v3123_v32, %v2620_v35  ;;  %v1597_v31 = vld [vmem:[#allocation5 + $0x78] sm:$0xff]  ;;  %v1596_v32 = vld [vmem:[#allocation5 + $0x70] sm:$0xff] }
 0x444   : > { %2936 = vmatpush3.msra.mxu0 %v1579_v2  ;;  %3005 = vmatpush3.msra.mxu1 %v1579_v2  ;;  %v1592_v2 = vld [vmem:[#allocation5 + $0x50] sm:$0xff] }
 0x445   : > { %2937 = vmatprep.subr.mxu0 %v1578_v54  ;;  %2998 = vmatprep.subr.mxu1 %v1578_v54 }
 0x446   : > { %2938 = vmatpush3.msra.mxu0 %v1578_v54  ;;  %3006 = vmatpush3.msra.mxu1 %v1578_v54 }
 0x447   : > { %2939 = vmatprep.subr.mxu0 %v1577_v51  ;;  %2999 = vmatprep.subr.mxu1 %v1577_v51 }
 0x448   : > { %2940 = vmatpush3.msra.mxu0 %v1577_v51  ;;  %3007 = vmatpush3.msra.mxu1 %v1577_v51 }
 0x449   : > { %2941 = vmatprep.subr.mxu0 %v1576_v44  ;;  %3000 = vmatprep.subr.mxu1 %v1576_v44 }
 0x44a   : > { %2942 = vmatpush3.msra.mxu0 %v1576_v44  ;;  %3008 = vmatpush3.msra.mxu1 %v1576_v44 }
 0x44b   : > { %2943 = vmatprep.subr.mxu0 %v1575_v41  ;;  %3001 = vmatprep.subr.mxu1 %v1575_v41 }
 0x44c   : > { %2944 = vmatpush3.msra.mxu0 %v1575_v41  ;;  %3009 = vmatpush3.msra.mxu1 %v1575_v41  ;;  %v1599_v41 = vld [vmem:[#allocation5 + $0x88] sm:$0xff] }
 0x44d   : > { %2945 = vmatprep.subr.mxu0 %v1574_v23  ;;  %3002 = vmatprep.subr.mxu1 %v1574_v23 }
 0x44e   : > { %2946 = vmatpush3.msra.mxu0 %v1574_v23  ;;  %3010 = vmatpush3.msra.mxu1 %v1574_v23  ;;  %v1598_v23 = vld [vmem:[#allocation5 + $0x80] sm:$0xff] }
 0x44f   : > { %2948 = vmatmul.mubr.msk.f32.vlgmr.msra.gmra.mxu0 %vm1678_vm4, %v3765_v14  ;;  %2954 = vmatmul.mubr.msk.f32.vlgmr.msra.gmra.mxu1 %vm1678_vm4, %v3772_v48  ;;  %v1643_v14 = vpop.trf.xlu1  ;;  %v1583_v48 = vld [vmem:[#allocation5 + $0x8] sm:$0xff] }
 0x450   : > { %2950 = vmatprep.mubr.msk.f32.mxu0 %vm1678_vm4, %v3767_v22  ;;  %2956 = vmatprep.mubr.msk.f32.mxu1 %vm1678_vm4, %v3776_v62 }
 0x453   : > { %2951 = vmatmul.mubr.msk.f32.gmra.mxu0 %vm1678_vm4, %v3769_v33  ;;  %2957 = vmatmul.mubr.msk.f32.gmra.mxu1 %vm1678_vm4, %v3780_v6  ;;  %v1644_v22 = vpop.trf.xlu1 }
 0x454   : > { %2959 = vmatprep.mubr.msk.f32.mxu1 %vm1678_vm4, %v3784_v59  ;;  %v1588_v59 = vld [vmem:[#allocation5 + $0x30] sm:$0xff] }
 0x457   : > { %2960 = vmatmul.mubr.msk.f32.gmra.mxu1 %vm1678_vm4, %v3790_v57  ;;  %v1645_v33 = vpop.trf.xlu1 }
 0x458   : > { %2962 = vmatprep.mubr.msk.f32.mxu1 %vm1678_vm4, %v1640_v27  ;;  %v1595_v27 = vld [vmem:[#allocation5 + $0x68] sm:$0xff] }
 0x45b   : > { %2963 = vmatmul.mubr.msk.f32.gmra.mxu1 %vm1678_vm4, %v1641_v34 }
 0x45c   : > { %2965 = vmatprep.mubr.msk.f32.mxu1 %vm1678_vm4, %v1642_v37 }
 0x45f   : > { %2966 = vmatmul.mubr.msk.f32.gmra.mxu1 %vm1678_vm4, %v1643_v14  ;;  %v1601_v14 = vld [vmem:[#allocation5 + $0x98] sm:$0xff] }
 0x460   : > { %2968 = vmatprep.mubr.msk.f32.mxu1 %vm1678_vm4, %v1644_v22 }
 0x463   : > { %2969 = vmatmul.mubr.msk.f32.gmra.mxu1 %vm1678_vm4, %v1645_v33 }
 0x464   : > { %2971 = vmatprep.mubr.msk.f32.mxu1 %vm1678_vm4, %v3774_v53 }
 0x467   : > { %2972 = vmatmul.mubr.msk.f32.gmra.mxu1 %vm1678_vm4, %v3778_v63 }
 0x468   : > { %2974 = vmatprep.mubr.msk.f32.mxu1 %vm1678_vm4, %v3782_v8 }
 0x46b   : > { %2975 = vmatmul.mubr.msk.f32.gmra.mxu1 %vm1678_vm4, %v3786_v11 }
 0x46c   : > { %2977 = vmatprep.mubr.msk.f32.mxu1 %vm1678_vm4, %v3793_v25 }
 0x46f   : > { %2978 = vmatmul.mubr.msk.f32.gmra.mxu1 %vm1678_vm4, %v3798_v30 }
 0x470   : > { %2980 = vmatprep.mubr.msk.f32.mxu1 %vm1678_vm4, %v1668_v36 }
 0x473   : > { %2981 = vmatmul.mubr.msk.f32.gmra.mxu1 %vm1678_vm4, %v1669_v24 }
 0x474   : > { %2983 = vmatprep.mubr.msk.f32.mxu1 %vm1678_vm4, %v1670_v38 }
 0x477   : > { %2984 = vmatmul.mubr.msk.f32.gmra.mxu1 %vm1678_vm4, %v1671_v39  ;;  %v1600_v39 = vld [vmem:[#allocation5 + $0x90] sm:$0xff] }
 0x478   : > { %2986 = vmatprep.mubr.msk.f32.mxu1 %vm1678_vm4, %v1672_v40 }
 0x47b   : > { %2987 = vmatmul.mubr.msk.f32.gmra.mxu1 %vm1678_vm4, %v1673_v42  ;;  %v1603_v42 = vld [vmem:[#allocation5 + $0xa8] sm:$0xff] }
 0x47c   : > { %2989 = vmatprep.mubr.msk.f32.mxu1 %vm1678_vm4, %v1674_v43 }
 0x47f   : > { %2990 = vmatmul.mubr.msk.f32.gmra.mxu1 %vm1678_vm4, %v1675_v45 }
 0x480   : > { %2992 = vmatprep.mubr.msk.f32.mxu1 %vm1678_vm4, %v1676_v46  ;;  %v1602_v46 = vld [vmem:[#allocation5 + $0xa0] sm:$0xff] }
 0x483   : > { %2993 = vmatmul.mubr.msk.f32.gmra.mxu1 %vm1678_vm4, %v1677_v47 }
 0x50f   : > { %v2949_v53 = vpop.f32.mrf.mxu0  ;;  %v2955_v55 = vpop.f32.mrf.mxu1 }
 0x510   : > { %v2001_v62 = vadd.f32 %v2949_v53, %v1583_v48  ;;  %v2005_v52 = vadd.f32 %v2955_v55, %v1587_v50  ;;  %v1605_v50 = vld [vmem:[#allocation5 + $0xb8] sm:$0xff] }
 0x511   : > { %v1841_v63 = vpop.f32.mrf.mxu0  ;;  %v1861_v0 = vpop.f32.mrf.mxu1 }
 0x512   : > { %2034 = vst.msk [vmem:[#allocation5 + $0x8] sm:$0xff] %vm2032_vm13, %v2001_v62  ;;  %2038 = vst.msk [vmem:[#allocation5 + $0x28] sm:$0xff] %vm2032_vm13, %v2005_v52  ;;  %v2000_v6 = vadd.f32 %v1841_v63, %v1582_v60  ;;  %v2004_v7 = vadd.f32 %v1861_v0, %v1586_v49  ;;  %v1604_v60 = vld [vmem:[#allocation5 + $0xb0] sm:$0xff]  ;;  %v1607_v52 = vld [vmem:[#allocation5 + $0xc8] sm:$0xff] }
 0x513   : > { %v2952_v8 = vpop.f32.mrf.mxu0  ;;  %v2958_v9 = vpop.f32.mrf.mxu1 }
 0x514   : > { %2033 = vst.msk [vmem:[#allocation5] sm:$0xff] %vm2032_vm13, %v2000_v6  ;;  %2037 = vst.msk [vmem:[#allocation5 + $0x20] sm:$0xff] %vm2032_vm13, %v2004_v7  ;;  %v2003_v61 = vadd.f32 %v2952_v8, %v1585_v3  ;;  %v2007_v11 = vadd.f32 %v2958_v9, %v1589_v4  ;;  %v1606_v3 = vld [vmem:[#allocation5 + $0xc0] sm:$0xff]  ;;  %v1609_v7 = vld [vmem:[#allocation5 + $0xd8] sm:$0xff] }
 0x515   : > { %v1851_v16 = vpop.f32.mrf.mxu0  ;;  %v1871_v17 = vpop.f32.mrf.mxu1 }
 0x516   : > { %2036 = vst.msk [vmem:[#allocation5 + $0x18] sm:$0xff] %vm2032_vm13, %v2003_v61  ;;  %2040 = vst.msk [vmem:[#allocation5 + $0x38] sm:$0xff] %vm2032_vm13, %v2007_v11  ;;  %v2002_v19 = vadd.f32 %v1851_v16, %v1584_v10  ;;  %v2006_v57 = vadd.f32 %v1871_v17, %v1588_v59  ;;  %v1608_v10 = vld [vmem:[#allocation5 + $0xd0] sm:$0xff]  ;;  %v1611_v11 = vld [vmem:[#allocation5 + $0xe8] sm:$0xff] }
 0x517   : > { %v2961_v20 = vpop.f32.mrf.mxu1 }
 0x518   : > { %2035 = vst.msk [vmem:[#allocation5 + $0x10] sm:$0xff] %vm2032_vm13, %v2002_v19  ;;  %2039 = vst.msk [vmem:[#allocation5 + $0x30] sm:$0xff] %vm2032_vm13, %v2006_v57  ;;  %v2009_v58 = vadd.f32 %v2961_v20, %v1591_v18  ;;  %v1610_v18 = vld [vmem:[#allocation5 + $0xe0] sm:$0xff]  ;;  %v1613_v20 = vld [vmem:[#allocation5 + $0xf8] sm:$0xff] }
 0x519   : > { %v1881_v25 = vpop.f32.mrf.mxu1 }
 0x51a   : > { %2042 = vst.msk [vmem:[#allocation5 + $0x48] sm:$0xff] %vm2032_vm13, %v2009_v58  ;;  %v2008_v1 = vadd.f32 %v1881_v25, %v1590_v21  ;;  %v1612_v25 = vld [vmem:[#allocation5 + $0xf0] sm:$0xff] }
 0x51b   : > { %v2964_v5 = vpop.f32.mrf.mxu1 }
 0x51c   : > { %2041 = vst.msk [vmem:[#allocation5 + $0x40] sm:$0xff] %vm2032_vm13, %v2008_v1  ;;  %v2011_v56 = vadd.f32 %v2964_v5, %v1593_v15 }
 0x51d   : > { %v1891_v26 = vpop.f32.mrf.mxu1 }
 0x51e   : > { %2044 = vst.msk [vmem:[#allocation5 + $0x58] sm:$0xff] %vm2032_vm13, %v2011_v56  ;;  %v2010_v54 = vadd.f32 %v1891_v26, %v1592_v2 }
 0x51f   : > { %v2967_v28 = vpop.f32.mrf.mxu1 }
 0x520   : > { %2043 = vst.msk [vmem:[#allocation5 + $0x50] sm:$0xff] %vm2032_vm13, %v2010_v54  ;;  %v2013_v30 = vadd.f32 %v2967_v28, %v1595_v27 }
 0x521   : > { %v1901_v51 = vpop.f32.mrf.mxu1 }
 0x522   : > { %2046 = vst.msk [vmem:[#allocation5 + $0x68] sm:$0xff] %vm2032_vm13, %v2013_v30  ;;  %v2012_v12 = vadd.f32 %v1901_v51, %v1594_v29 }
 0x523   : > { %v2970_v44 = vpop.f32.mrf.mxu1 }
 0x524   : > { %2045 = vst.msk [vmem:[#allocation5 + $0x60] sm:$0xff] %vm2032_vm13, %v2012_v12  ;;  %v2015_v13 = vadd.f32 %v2970_v44, %v1597_v31 }
 0x525   : > { %v1911_v34 = vpop.f32.mrf.mxu1 }
 0x526   : > { %2048 = vst.msk [vmem:[#allocation5 + $0x78] sm:$0xff] %vm2032_vm13, %v2015_v13  ;;  %v2014_v35 = vadd.f32 %v1911_v34, %v1596_v32 }
 0x527   : > { %v2973_v36 = vpop.f32.mrf.mxu1 }
 0x528   : > { %2047 = vst.msk [vmem:[#allocation5 + $0x70] sm:$0xff] %vm2032_vm13, %v2014_v35  ;;  %v2017_v37 = vadd.f32 %v2973_v36, %v1599_v41 }
 0x529   : > { %v1921_v24 = vpop.f32.mrf.mxu1 }
 0x52a   : > { %2050 = vst.msk [vmem:[#allocation5 + $0x88] sm:$0xff] %vm2032_vm13, %v2017_v37  ;;  %v2016_v38 = vadd.f32 %v1921_v24, %v1598_v23 }
 0x52b   : > { %v2976_v22 = vpop.f32.mrf.mxu1 }
 0x52c   : > { %2049 = vst.msk [vmem:[#allocation5 + $0x80] sm:$0xff] %vm2032_vm13, %v2016_v38  ;;  %v2019_v33 = vadd.f32 %v2976_v22, %v1601_v14 }
 0x52d   : > { %v1931_v40 = vpop.f32.mrf.mxu1 }
 0x52e   : > { %2052 = vst.msk [vmem:[#allocation5 + $0x98] sm:$0xff] %vm2032_vm13, %v2019_v33  ;;  %v2018_v43 = vadd.f32 %v1931_v40, %v1600_v39 }
 0x52f   : > { %v2979_v45 = vpop.f32.mrf.mxu1 }
 0x530   : > { %2051 = vst.msk [vmem:[#allocation5 + $0x90] sm:$0xff] %vm2032_vm13, %v2018_v43  ;;  %v2021_v47 = vadd.f32 %v2979_v45, %v1603_v42 }
 0x531   : > { %v1941_v48 = vpop.f32.mrf.mxu1 }
 0x532   : > { %2054 = vst.msk [vmem:[#allocation5 + $0xa8] sm:$0xff] %vm2032_vm13, %v2021_v47  ;;  %v2020_v53 = vadd.f32 %v1941_v48, %v1602_v46 }
 0x533   : > { %v2982_v55 = vpop.f32.mrf.mxu1 }
 0x534   : > { %2053 = vst.msk [vmem:[#allocation5 + $0xa0] sm:$0xff] %vm2032_vm13, %v2020_v53  ;;  %v2023_v49 = vadd.f32 %v2982_v55, %v1605_v50 }
 0x535   : > { %v1951_v62 = vpop.f32.mrf.mxu1 }
 0x536   : > { %2056 = vst.msk [vmem:[#allocation5 + $0xb8] sm:$0xff] %vm2032_vm13, %v2023_v49  ;;  %v2022_v63 = vadd.f32 %v1951_v62, %v1604_v60 }
 0x537   : > { %v2985_v0 = vpop.f32.mrf.mxu1 }
 0x538   : > { %2055 = vst.msk [vmem:[#allocation5 + $0xb0] sm:$0xff] %vm2032_vm13, %v2022_v63  ;;  %v2025_v4 = vadd.f32 %v2985_v0, %v1607_v52 }
 0x539   : > { %v1961_v6 = vpop.f32.mrf.mxu1 }
 0x53a   : > { %2058 = vst.msk [vmem:[#allocation5 + $0xc8] sm:$0xff] %vm2032_vm13, %v2025_v4  ;;  %v2024_v8 = vadd.f32 %v1961_v6, %v1606_v3 }
 0x53b   : > { %v2988_v9 = vpop.f32.mrf.mxu1 }
 0x53c   : > { %2057 = vst.msk [vmem:[#allocation5 + $0xc0] sm:$0xff] %vm2032_vm13, %v2024_v8  ;;  %v2027_v59 = vadd.f32 %v2988_v9, %v1609_v7 }
 0x53d   : > { %v1971_v61 = vpop.f32.mrf.mxu1 }
 0x53e   : > { %2060 = vst.msk [vmem:[#allocation5 + $0xd8] sm:$0xff] %vm2032_vm13, %v2027_v59  ;;  %v2026_v16 = vadd.f32 %v1971_v61, %v1608_v10 }
 0x53f   : > { %v2991_v17 = vpop.f32.mrf.mxu1 }
 0x540   : > { %2059 = vst.msk [vmem:[#allocation5 + $0xd0] sm:$0xff] %vm2032_vm13, %v2026_v16  ;;  %v2029_v19 = vadd.f32 %v2991_v17, %v1611_v11 }
 0x541   : > { %v1981_v57 = vpop.f32.mrf.mxu1 }
 0x542   : > { %2062 = vst.msk [vmem:[#allocation5 + $0xe8] sm:$0xff] %vm2032_vm13, %v2029_v19  ;;  %v2028_v21 = vadd.f32 %v1981_v57, %v1610_v18 }
 0x543   : > { %v2994_v58 = vpop.f32.mrf.mxu1 }
 0x544   : > { %2061 = vst.msk [vmem:[#allocation5 + $0xe0] sm:$0xff] %vm2032_vm13, %v2028_v21  ;;  %v2031_v15 = vadd.f32 %v2994_v58, %v1613_v20  ;;  %2068 = sbr.rel (%p2660_p8) target bundleno = 1544 (0x608), region = 52 }
 0x545   : > { %v1991_v1 = vpop.f32.mrf.mxu1 }
 0x546   : > { %2064 = vst.msk [vmem:[#allocation5 + $0xf8] sm:$0xff] %vm2032_vm13, %v2031_v15  ;;  %v2030_v5 = vadd.f32 %v1991_v1, %v1612_v25 }
 0x548   : > { %2063 = vst.msk [vmem:[#allocation5 + $0xf0] sm:$0xff] %vm2032_vm13, %v2030_v5 }
 0x549   : > { %v2103_v2 = vld [vmem:[#allocation5 + $0x10] sm:$0xff]  ;;  %v2101_v56 = vld [vmem:[#allocation5] sm:$0xff]  ;;  %v3171_v26 = vmov 0   ;;  %v2104_v27 = vld [vmem:[#allocation5 + $0x18] sm:$0xff]  ;;  %vm2364_vm14 = vcmask 64512  }
 0x54a   : > { %3125 = vset.pattern.permute.xlu1 %v3171_v26  ;;  %3124 = vset.pattern.permute.xlu0 %v3171_v26  ;;  %v2102_v54 = vld [vmem:[#allocation5 + $0x8] sm:$0xff]  ;;  %v2105_v29 = vld [vmem:[#allocation5 + $0x20] sm:$0xff]  ;;  %v2108_v30 = vld [vmem:[#allocation5 + $0x38] sm:$0xff] }
 0x54b   : > { %2145 = vperm.xlu1 %3125, %v2103_v2   ;;  %2135 = vperm.xlu0 %3124, %v2101_v56   ;;  %v2106_v28 = vld [vmem:[#allocation5 + $0x28] sm:$0xff]  ;;  %v2107_v51 = vld [vmem:[#allocation5 + $0x30] sm:$0xff]  ;;  %v2109_v12 = vld [vmem:[#allocation5 + $0x40] sm:$0xff] }
 0x54c   : > { %v2110_v31 = vld [vmem:[#allocation5 + $0x48] sm:$0xff]  ;;  %v2112_v44 = vld [vmem:[#allocation5 + $0x58] sm:$0xff]  ;;  %v2111_v32 = vld [vmem:[#allocation5 + $0x50] sm:$0xff] }
 0x54d   : > { %v2114_v13 = vld [vmem:[#allocation5 + $0x68] sm:$0xff]  ;;  %v2113_v34 = vld [vmem:[#allocation5 + $0x60] sm:$0xff]  ;;  %v2116_v41 = vld [vmem:[#allocation5 + $0x78] sm:$0xff] }
 0x54e   : > { %v2115_v35 = vld [vmem:[#allocation5 + $0x70] sm:$0xff]  ;;  %v2118_v36 = vld [vmem:[#allocation5 + $0x88] sm:$0xff]  ;;  %v2117_v23 = vld [vmem:[#allocation5 + $0x80] sm:$0xff] }
 0x54f   : > { %2150 = vperm.xlu1 %3125, %v2104_v27   ;;  %2140 = vperm.xlu0 %3124, %v2102_v54   ;;  %v2120_v37 = vld [vmem:[#allocation5 + $0x98] sm:$0xff]  ;;  %v2119_v24 = vld [vmem:[#allocation5 + $0x90] sm:$0xff]  ;;  %v2122_v14 = vld [vmem:[#allocation5 + $0xa8] sm:$0xff] }
 0x550   : > { %v2121_v38 = vld [vmem:[#allocation5 + $0xa0] sm:$0xff]  ;;  %v2124_v22 = vld [vmem:[#allocation5 + $0xb8] sm:$0xff]  ;;  %v2123_v39 = vld [vmem:[#allocation5 + $0xb0] sm:$0xff] }
 0x551   : > { %v2126_v33 = vld [vmem:[#allocation5 + $0xc8] sm:$0xff]  ;;  %v2125_v40 = vld [vmem:[#allocation5 + $0xc0] sm:$0xff]  ;;  %v2128_v42 = vld [vmem:[#allocation5 + $0xd8] sm:$0xff] }
 0x552   : > { %v2127_v43 = vld [vmem:[#allocation5 + $0xd0] sm:$0xff]  ;;  %v2130_v45 = vld [vmem:[#allocation5 + $0xe8] sm:$0xff]  ;;  %v2129_v46 = vld [vmem:[#allocation5 + $0xe0] sm:$0xff] }
 0x553   : > { %2160 = vperm.xlu1 %3125, %v2106_v28   ;;  %2155 = vperm.xlu0 %3124, %v2105_v29   ;;  %v2132_v47 = vld [vmem:[#allocation5 + $0xf8] sm:$0xff]  ;;  %v2131_v48 = vld [vmem:[#allocation5 + $0xf0] sm:$0xff]  ;;  %v2070_v0 = vld [vmem:[#allocation2 + $0x8] sm:$0xff] }
 0x554   : > { %v2071_v50 = vld [vmem:[#allocation2 + $0x10] sm:$0xff]  ;;  %v2069_v53 = vld [vmem:[#allocation2] sm:$0xff]  ;;  %v2072_v63 = vld [vmem:[#allocation2 + $0x18] sm:$0xff] }
 0x555   : > { %v3884_v55 = vld [vmem:[%s321_s17] ss:$0 sm:$0xff]  ;;  %v2074_v10 = vld [vmem:[#allocation2 + $0x28] sm:$0xff]  ;;  %v2076_v57 = vld [vmem:[#allocation2 + $0x38] sm:$0xff] }
 0x556   : > { %v2073_v59 = vld [vmem:[#allocation2 + $0x20] sm:$0xff]  ;;  %v2075_v20 = vld [vmem:[#allocation2 + $0x30] sm:$0xff]  ;;  %v2078_v2 = vld [vmem:[#allocation2 + $0x48] sm:$0xff] }
 0x557   : > { %2170 = vperm.xlu1 %3125, %v2108_v30   ;;  %2165 = vperm.xlu0 %3124, %v2107_v51   ;;  %v2077_v56 = vld [vmem:[#allocation2 + $0x40] sm:$0xff]  ;;  %v2080_v51 = vld [vmem:[#allocation2 + $0x58] sm:$0xff] }
 0x55b   : > { %2180 = vperm.xlu1 %3125, %v2110_v31   ;;  %2175 = vperm.xlu0 %3124, %v2109_v12   ;;  %v2079_v31 = vld [vmem:[#allocation2 + $0x50] sm:$0xff] }
 0x55f   : > { %2190 = vperm.xlu1 %3125, %v2112_v44   ;;  %2185 = vperm.xlu0 %3124, %v2111_v32  }
 0x563   : > { %2200 = vperm.xlu1 %3125, %v2114_v13   ;;  %2195 = vperm.xlu0 %3124, %v2113_v34  }
 0x567   : > { %2210 = vperm.xlu1 %3125, %v2116_v41   ;;  %2205 = vperm.xlu0 %3124, %v2115_v35   ;;  %v2082_v35 = vld [vmem:[#allocation2 + $0x68] sm:$0xff] }
 0x56b   : > { %2220 = vperm.xlu1 %3125, %v2118_v36   ;;  %2215 = vperm.xlu0 %3124, %v2117_v23   ;;  %v2081_v36 = vld [vmem:[#allocation2 + $0x60] sm:$0xff] }
 0x56f   : > { %2230 = vperm.xlu1 %3125, %v2120_v37   ;;  %2225 = vperm.xlu0 %3124, %v2119_v24  }
 0x573   : > { %2240 = vperm.xlu1 %3125, %v2122_v14   ;;  %2235 = vperm.xlu0 %3124, %v2121_v38  }
 0x577   : > { %2250 = vperm.xlu1 %3125, %v2124_v22   ;;  %2245 = vperm.xlu0 %3124, %v2123_v39   ;;  %v2084_v39 = vld [vmem:[#allocation2 + $0x78] sm:$0xff] }
 0x57b   : > { %2260 = vperm.xlu1 %3125, %v2126_v33   ;;  %2255 = vperm.xlu0 %3124, %v2125_v40   ;;  %v2083_v33 = vld [vmem:[#allocation2 + $0x70] sm:$0xff] }
 0x57f   : > { %2270 = vperm.xlu1 %3125, %v2128_v42   ;;  %2265 = vperm.xlu0 %3124, %v2127_v43  }
 0x583   : > { %2280 = vperm.xlu1 %3125, %v2130_v45   ;;  %2275 = vperm.xlu0 %3124, %v2129_v46  }
 0x587   : > { %2290 = vperm.xlu1 %3125, %v2132_v47   ;;  %2285 = vperm.xlu0 %3124, %v2131_v48   ;;  %v2086_v48 = vld [vmem:[#allocation2 + $0x88] sm:$0xff] }
 0x5c6   : > { %v2146_v60 = vpop.permute.xlu1 %2145  ;;  %v2136_v49 = vpop.permute.xlu0 %2135 }
 0x5c7   : > { %v2295_v62 = vmul.f32 %v2146_v60, %v2071_v50  ;;  %v2293_v52 = vmul.f32 %v2136_v49, %v2069_v53  ;;  %v2085_v50 = vld [vmem:[#allocation2 + $0x80] sm:$0xff] }
 0x5c9   : > { %v2334_v3 = vadd.f32 %v3884_v55, %v2295_v62  ;;  %v2332_v4 = vadd.f32 %v3884_v55, %v2293_v52 }
 0x5ca   : > { %v2151_v6 = vpop.permute.xlu1 %2150  ;;  %v2141_v7 = vpop.permute.xlu0 %2140 }
 0x5cb   : > { %2367 = vst.msk [vmem:[%s3268_s9 + $0x10] sm:$0xff] %vm2364_vm14, %v2334_v3  ;;  %2365 = vst.msk [vmem:[%s3268_s9] sm:$0xff] %vm2364_vm14, %v2332_v4  ;;  %v2296_v8 = vmul.f32 %v2151_v6, %v2072_v63  ;;  %v2294_v9 = vmul.f32 %v2141_v7, %v2070_v0  ;;  %v2088_v0 = vld [vmem:[#allocation2 + $0x98] sm:$0xff]  ;;  %v2087_v3 = vld [vmem:[#allocation2 + $0x90] sm:$0xff] }
 0x5cd   : > { %v2335_v61 = vadd.f32 %v3884_v55, %v2296_v8  ;;  %v2333_v11 = vadd.f32 %v3884_v55, %v2294_v9 }
 0x5ce   : > { %v2161_v16 = vpop.permute.xlu1 %2160  ;;  %v2156_v17 = vpop.permute.xlu0 %2155 }
 0x5cf   : > { %2368 = vst.msk [vmem:[%s3268_s9 + $0x18] sm:$0xff] %vm2364_vm14, %v2335_v61  ;;  %2366 = vst.msk [vmem:[%s3268_s9 + $0x8] sm:$0xff] %vm2364_vm14, %v2333_v11  ;;  %v2298_v18 = vmul.f32 %v2161_v16, %v2074_v10  ;;  %v2297_v19 = vmul.f32 %v2156_v17, %v2073_v59  ;;  %v2090_v59 = vld [vmem:[#allocation2 + $0xa8] sm:$0xff]  ;;  %v2089_v61 = vld [vmem:[#allocation2 + $0xa0] sm:$0xff] }
 0x5d1   : > { %v2337_v21 = vadd.f32 %v3884_v55, %v2298_v18  ;;  %v2336_v58 = vadd.f32 %v3884_v55, %v2297_v19 }
 0x5d2   : > { %v2171_v25 = vpop.permute.xlu1 %2170  ;;  %v2166_v15 = vpop.permute.xlu0 %2165 }
 0x5d3   : > { %2370 = vst.msk [vmem:[%s3268_s9 + $0x28] sm:$0xff] %vm2364_vm14, %v2337_v21  ;;  %2369 = vst.msk [vmem:[%s3268_s9 + $0x20] sm:$0xff] %vm2364_vm14, %v2336_v58  ;;  %v2300_v1 = vmul.f32 %v2171_v25, %v2076_v57  ;;  %v2299_v5 = vmul.f32 %v2166_v15, %v2075_v20  ;;  %v2092_v20 = vld [vmem:[#allocation2 + $0xb8] sm:$0xff]  ;;  %v2091_v21 = vld [vmem:[#allocation2 + $0xb0] sm:$0xff] }
 0x5d5   : > { %v2339_v26 = vadd.f32 %v3884_v55, %v2300_v1  ;;  %v2338_v27 = vadd.f32 %v3884_v55, %v2299_v5 }
 0x5d6   : > { %v2181_v54 = vpop.permute.xlu1 %2180  ;;  %v2176_v28 = vpop.permute.xlu0 %2175 }
 0x5d7   : > { %2372 = vst.msk [vmem:[%s3268_s9 + $0x38] sm:$0xff] %vm2364_vm14, %v2339_v26  ;;  %2371 = vst.msk [vmem:[%s3268_s9 + $0x30] sm:$0xff] %vm2364_vm14, %v2338_v27  ;;  %v2302_v29 = vmul.f32 %v2181_v54, %v2078_v2  ;;  %v2301_v30 = vmul.f32 %v2176_v28, %v2077_v56  ;;  %v2094_v56 = vld [vmem:[#allocation2 + $0xc8] sm:$0xff]  ;;  %v2093_v26 = vld [vmem:[#allocation2 + $0xc0] sm:$0xff] }
 0x5d9   : > { %v2341_v12 = vadd.f32 %v3884_v55, %v2302_v29  ;;  %v2340_v44 = vadd.f32 %v3884_v55, %v2301_v30 }
 0x5da   : > { %v2191_v32 = vpop.permute.xlu1 %2190  ;;  %v2186_v13 = vpop.permute.xlu0 %2185 }
 0x5db   : > { %2374 = vst.msk [vmem:[%s3268_s9 + $0x48] sm:$0xff] %vm2364_vm14, %v2341_v12  ;;  %2373 = vst.msk [vmem:[%s3268_s9 + $0x40] sm:$0xff] %vm2364_vm14, %v2340_v44  ;;  %v2304_v34 = vmul.f32 %v2191_v32, %v2080_v51  ;;  %v2303_v41 = vmul.f32 %v2186_v13, %v2079_v31  ;;  %v2096_v31 = vld [vmem:[#allocation2 + $0xd8] sm:$0xff]  ;;  %v2095_v12 = vld [vmem:[#allocation2 + $0xd0] sm:$0xff] }
 0x5dd   : > { %v2343_v23 = vadd.f32 %v3884_v55, %v2304_v34  ;;  %v2342_v37 = vadd.f32 %v3884_v55, %v2303_v41 }
 0x5de   : > { %v2201_v24 = vpop.permute.xlu1 %2200  ;;  %v2196_v14 = vpop.permute.xlu0 %2195 }
 0x5df   : > { %2376 = vst.msk [vmem:[%s3268_s9 + $0x58] sm:$0xff] %vm2364_vm14, %v2343_v23  ;;  %2375 = vst.msk [vmem:[%s3268_s9 + $0x50] sm:$0xff] %vm2364_vm14, %v2342_v37  ;;  %v2306_v38 = vmul.f32 %v2201_v24, %v2082_v35  ;;  %v2305_v22 = vmul.f32 %v2196_v14, %v2081_v36  ;;  %v2098_v36 = vld [vmem:[#allocation2 + $0xe8] sm:$0xff]  ;;  %v2097_v23 = vld [vmem:[#allocation2 + $0xe0] sm:$0xff] }
 0x5e1   : > { %v2345_v40 = vadd.f32 %v3884_v55, %v2306_v38  ;;  %v2344_v42 = vadd.f32 %v3884_v55, %v2305_v22 }
 0x5e2   : > { %v2211_v43 = vpop.permute.xlu1 %2210  ;;  %v2206_v45 = vpop.permute.xlu0 %2205 }
 0x5e3   : > { %2378 = vst.msk [vmem:[%s3268_s9 + $0x68] sm:$0xff] %vm2364_vm14, %v2345_v40  ;;  %2377 = vst.msk [vmem:[%s3268_s9 + $0x60] sm:$0xff] %vm2364_vm14, %v2344_v42  ;;  %v2308_v46 = vmul.f32 %v2211_v43, %v2084_v39  ;;  %v2307_v47 = vmul.f32 %v2206_v45, %v2083_v33  ;;  %v2100_v33 = vld [vmem:[#allocation2 + $0xf8] sm:$0xff]  ;;  %v2099_v40 = vld [vmem:[#allocation2 + $0xf0] sm:$0xff] }
 0x5e5   : > { %v2347_v53 = vadd.f32 %v3884_v55, %v2308_v46  ;;  %v2346_v60 = vadd.f32 %v3884_v55, %v2307_v47 }
 0x5e6   : > { %v2221_v49 = vpop.permute.xlu1 %2220  ;;  %v2216_v62 = vpop.permute.xlu0 %2215 }
 0x5e7   : > { %2380 = vst.msk [vmem:[%s3268_s9 + $0x78] sm:$0xff] %vm2364_vm14, %v2347_v53  ;;  %2379 = vst.msk [vmem:[%s3268_s9 + $0x70] sm:$0xff] %vm2364_vm14, %v2346_v60  ;;  %v2310_v52 = vmul.f32 %v2221_v49, %v2086_v48  ;;  %v2309_v63 = vmul.f32 %v2216_v62, %v2085_v50 }
 0x5e9   : > { %v2349_v4 = vadd.f32 %v3884_v55, %v2310_v52  ;;  %v2348_v6 = vadd.f32 %v3884_v55, %v2309_v63 }
 0x5ea   : > { %v2231_v7 = vpop.permute.xlu1 %2230  ;;  %v2226_v8 = vpop.permute.xlu0 %2225 }
 0x5eb   : > { %2382 = vst.msk [vmem:[%s3268_s9 + $0x88] sm:$0xff] %vm2364_vm14, %v2349_v4  ;;  %2381 = vst.msk [vmem:[%s3268_s9 + $0x80] sm:$0xff] %vm2364_vm14, %v2348_v6  ;;  %v2312_v9 = vmul.f32 %v2231_v7, %v2088_v0  ;;  %v2311_v10 = vmul.f32 %v2226_v8, %v2087_v3 }
 0x5ed   : > { %v2351_v11 = vadd.f32 %v3884_v55, %v2312_v9  ;;  %v2350_v16 = vadd.f32 %v3884_v55, %v2311_v10 }
 0x5ee   : > { %v2241_v17 = vpop.permute.xlu1 %2240  ;;  %v2236_v18 = vpop.permute.xlu0 %2235 }
 0x5ef   : > { %2384 = vst.msk [vmem:[%s3268_s9 + $0x98] sm:$0xff] %vm2364_vm14, %v2351_v11  ;;  %2383 = vst.msk [vmem:[%s3268_s9 + $0x90] sm:$0xff] %vm2364_vm14, %v2350_v16  ;;  %v2314_v19 = vmul.f32 %v2241_v17, %v2090_v59  ;;  %v2313_v57 = vmul.f32 %v2236_v18, %v2089_v61 }
 0x5f1   : > { %v2353_v58 = vadd.f32 %v3884_v55, %v2314_v19  ;;  %v2352_v25 = vadd.f32 %v3884_v55, %v2313_v57 }
 0x5f2   : > { %v2251_v15 = vpop.permute.xlu1 %2250  ;;  %v2246_v1 = vpop.permute.xlu0 %2245 }
 0x5f3   : > { %2386 = vst.msk [vmem:[%s3268_s9 + $0xa8] sm:$0xff] %vm2364_vm14, %v2353_v58  ;;  %2385 = vst.msk [vmem:[%s3268_s9 + $0xa0] sm:$0xff] %vm2364_vm14, %v2352_v25  ;;  %v2316_v5 = vmul.f32 %v2251_v15, %v2092_v20  ;;  %v2315_v2 = vmul.f32 %v2246_v1, %v2091_v21 }
 0x5f5   : > { %v2355_v27 = vadd.f32 %v3884_v55, %v2316_v5  ;;  %v2354_v54 = vadd.f32 %v3884_v55, %v2315_v2 }
 0x5f6   : > { %v2261_v28 = vpop.permute.xlu1 %2260  ;;  %v2256_v29 = vpop.permute.xlu0 %2255 }
 0x5f7   : > { %2388 = vst.msk [vmem:[%s3268_s9 + $0xb8] sm:$0xff] %vm2364_vm14, %v2355_v27  ;;  %2387 = vst.msk [vmem:[%s3268_s9 + $0xb0] sm:$0xff] %vm2364_vm14, %v2354_v54  ;;  %v2318_v30 = vmul.f32 %v2261_v28, %v2094_v56  ;;  %v2317_v51 = vmul.f32 %v2256_v29, %v2093_v26 }
 0x5f9   : > { %v2357_v44 = vadd.f32 %v3884_v55, %v2318_v30  ;;  %v2356_v32 = vadd.f32 %v3884_v55, %v2317_v51 }
 0x5fa   : > { %v2271_v13 = vpop.permute.xlu1 %2270  ;;  %v2266_v34 = vpop.permute.xlu0 %2265 }
 0x5fb   : > { %2390 = vst.msk [vmem:[%s3268_s9 + $0xc8] sm:$0xff] %vm2364_vm14, %v2357_v44  ;;  %2389 = vst.msk [vmem:[%s3268_s9 + $0xc0] sm:$0xff] %vm2364_vm14, %v2356_v32  ;;  %v2320_v41 = vmul.f32 %v2271_v13, %v2096_v31  ;;  %v2319_v35 = vmul.f32 %v2266_v34, %v2095_v12 }
 0x5fd   : > { %v2359_v37 = vadd.f32 %v3884_v55, %v2320_v41  ;;  %v2358_v24 = vadd.f32 %v3884_v55, %v2319_v35 }
 0x5fe   : > { %v2281_v14 = vpop.permute.xlu1 %2280  ;;  %v2276_v38 = vpop.permute.xlu0 %2275 }
 0x5ff   : > { %2392 = vst.msk [vmem:[%s3268_s9 + $0xd8] sm:$0xff] %vm2364_vm14, %v2359_v37  ;;  %2391 = vst.msk [vmem:[%s3268_s9 + $0xd0] sm:$0xff] %vm2364_vm14, %v2358_v24  ;;  %v2322_v22 = vmul.f32 %v2281_v14, %v2098_v36  ;;  %v2321_v39 = vmul.f32 %v2276_v38, %v2097_v23 }
 0x601   : > { %v2361_v42 = vadd.f32 %v3884_v55, %v2322_v22  ;;  %v2360_v43 = vadd.f32 %v3884_v55, %v2321_v39 }
 0x602   : > { %v2291_v45 = vpop.permute.xlu1 %2290  ;;  %v2286_v46 = vpop.permute.xlu0 %2285 }
 0x603   : > { %2394 = vst.msk [vmem:[%s3268_s9 + $0xe8] sm:$0xff] %vm2364_vm14, %v2361_v42  ;;  %2393 = vst.msk [vmem:[%s3268_s9 + $0xe0] sm:$0xff] %vm2364_vm14, %v2360_v43  ;;  %v2324_v47 = vmul.f32 %v2291_v45, %v2100_v33  ;;  %v2323_v48 = vmul.f32 %v2286_v46, %v2099_v40 }
 0x605   : > { %v2363_v50 = vadd.f32 %v3884_v55, %v2324_v47  ;;  %v2362_v53 = vadd.f32 %v3884_v55, %v2323_v48 }
 0x607   : > { %2396 = vst.msk [vmem:[%s3268_s9 + $0xf8] sm:$0xff] %vm2364_vm14, %v2363_v50  ;;  %2395 = vst.msk [vmem:[%s3268_s9 + $0xf0] sm:$0xff] %vm2364_vm14, %v2362_v53 }
 0x608 PF: > { %s16_s25 = sadd.s32 1, %s3164_s25   ;;  %s4006_s17 = sld [smem:[#allocation6_spill]] }
 0x609   : > { %p13_p9 = scmp.ge.s32.totalorder %s16_s25, 10   ;;  %s4007_s21 = smov %s3156_s23 }
 0x60a   : > { %s4008_s22 = smov %s3160_s24  ;;  %s4009_s23 = smov %s4012_s26 }
 0x60b   :  { %15 = sbr.rel (!%p13_p9) target bundleno = 3 (0x3), region = 95 }
 0x60e   : > { %s4010_s24 = smov %s4006_s17 }

</bundles_post_ra>
